<compile_context>
chip_gen: v5e
topology: v5e:2x2
jax: 0.10.0
libtpu: 0.0.40
codegen_flags: <defaults>
</compile_context>

<pallas_src>
import math

import jax
import jax.numpy as jnp
from jax.experimental import pallas as pl
from jax.experimental.pallas import tpu as pltpu

LANE = 128  # TPU lane width

# Compatibility shim: newer JAX uses pltpu.CompilerParams, older TPUCompilerParams.
_CompilerParams = getattr(pltpu, "CompilerParams", None) or getattr(
    pltpu, "TPUCompilerParams"
)


def _round_up(n, m):
    return ((n + m - 1) // m) * m


def _pad_to(a, axis, size):
    pad = size - a.shape[axis]
    if pad <= 0:
        return a
    widths = [(0, 0)] * a.ndim
    widths[axis] = (0, pad)
    return jnp.pad(a, widths)


def mlp_kernel(x_ref, w1_ref, b1_ref, w2_ref, b2_ref, w3_ref, b3_ref, o_ref):
    # One [TB, in] batch tile in VMEM; all lane-padded weights/biases are
    # resident (constant block index -> DMA'd once, single-buffered).
    x = x_ref[...].astype(jnp.float32)

    h = jnp.dot(x, w1_ref[...], preferred_element_type=jnp.float32) + b1_ref[...]
    h = jnp.maximum(h, 0.0)

    h = jnp.dot(h, w2_ref[...], preferred_element_type=jnp.float32) + b2_ref[...]
    h = jnp.maximum(h, 0.0)

    out = jnp.dot(h, w3_ref[...], preferred_element_type=jnp.float32) + b3_ref[...]
    # Store only the real output features (o_ref is [TB, out_f]); the narrow
    # masked store is negligible next to the HBM bytes it saves.
    o_ref[...] = out[:, : o_ref.shape[-1]].astype(o_ref.dtype)


def mlp_forward(x, params, *, block_batch=4096, min_grid_steps=2, stream_bf16=False):
    """x: [B, in_features] float32. params: dict of (w1,b1,w2,b2,w3,b3)
    with weights as [in, out] and biases as [1, out]."""
    w1, b1, w2, b2, w3, b3 = (
        params["w1"], params["b1"], params["w2"],
        params["b2"], params["w3"], params["b3"],
    )
    in_f, h1 = w1.shape
    h2 = w2.shape[1]
    out_f = w3.shape[1]

    # Lane-pad the hidden dims (and w3's output lanes, sliced off in-kernel
    # before the store). Zero padding is exact through ReLU.
    h1p, h2p = _round_up(h1, LANE), _round_up(h2, LANE)
    outp = _round_up(out_f, LANE)
    w1p = _pad_to(w1, 1, h1p)
    b1p = _pad_to(b1, 1, h1p)
    w2p = _pad_to(_pad_to(w2, 0, h1p), 1, h2p)
    b2p = _pad_to(b2, 1, h2p)
    w3p = _pad_to(_pad_to(w3, 0, h2p), 1, outp)
    b3p = _pad_to(b3, 1, outp)

    B = x.shape[0]

    # Choose the batch tile: as large as block_batch allows, but keep at least
    # `min_grid_steps` grid steps (v7x: 2 TensorCores under "parallel"), and
    # sublane-align (multiple of 8) whenever the batch is actually tiled.
    tb = min(block_batch, B)
    if min_grid_steps > 1 and B >= 8 * 2 * min_grid_steps:
        tb = min(tb, _round_up(pl.cdiv(B, min_grid_steps), 8))
    if tb < B:
        tb = max(8, (tb // 8) * 8)
    grid = (pl.cdiv(B, tb),)

    if stream_bf16:
        x_in = x.astype(jnp.bfloat16)
        out_dtype = jnp.bfloat16
    else:
        x_in = x
        out_dtype = jnp.float32

    def run(single_buffer_consts):
        if single_buffer_consts and hasattr(pl, "Buffered"):
            const_kw = dict(pipeline_mode=pl.Buffered(1))
        else:
            const_kw = {}

        def const_spec(shape):
            # Constant block index -> weights stay resident in VMEM.
            return pl.BlockSpec(shape, lambda i: (0, 0), **const_kw)

        return pl.pallas_call(
            mlp_kernel,
            out_shape=jax.ShapeDtypeStruct((B, out_f), out_dtype),
            grid=grid,
            in_specs=[
                pl.BlockSpec((tb, in_f), lambda i: (i, 0)),   # streamed batch tile
                const_spec((in_f, h1p)),
                const_spec((1, h1p)),
                const_spec((h1p, h2p)),
                const_spec((1, h2p)),
                const_spec((h2p, outp)),
                const_spec((1, outp)),
            ],
            out_specs=pl.BlockSpec((tb, out_f), lambda i: (i, 0)),
            compiler_params=_CompilerParams(dimension_semantics=("parallel",)),
        )(x_in, w1p, b1p, w2p, b2p, w3p, b3p)

    try:
        out = run(True)
    except Exception:
        # Fallback if single-buffered pipeline_mode is unsupported on this
        # JAX version; the only cost is ~132 KiB of extra VMEM.
        out = run(False)
    return out


def init_params(key, in_features=4, h1=8, h2=9, out_features=3):
    """PyTorch-style uniform(+-1/sqrt(fan_in)) init.
    Weights stored as [in, out]; biases as [1, out]."""
    dims = [(in_features, h1), (h1, h2), (h2, out_features)]
    params = {}
    for idx, (fan_in, fan_out) in enumerate(dims, start=1):
        key, kw, kb = jax.random.split(key, 3)
        bound = 1.0 / math.sqrt(fan_in)
        params[f"w{idx}"] = jax.random.uniform(
            kw, (fan_in, fan_out), jnp.float32, minval=-bound, maxval=bound)
        params[f"b{idx}"] = jax.random.uniform(
            kb, (1, fan_out), jnp.float32, minval=-bound, maxval=bound)
    return params


def mlp_reference(x, params):
    h = jnp.maximum(x @ params["w1"] + params["b1"], 0.0)
    h = jnp.maximum(h @ params["w2"] + params["b2"], 0.0)
    return h @ params["w3"] + params["b3"]


if __name__ == "__main__":
    key = jax.random.PRNGKey(0)
    key, kx = jax.random.split(key)

    batch, in_features = 200, 4
    x = jax.random.normal(kx, (batch, in_features), jnp.float32)
    params = init_params(key, in_features=4, h1=8, h2=9, out_features=3)

    # With batch=200 the tile chooser keeps >=2 grid steps (tb=104 -> grid=(2,)),
    # exercising the tiled path including a ragged final tile (rows 104..199).
    out = mlp_forward(x, params)
    out = jax.block_until_ready(out)

    ref = mlp_reference(x, params)
    assert out.shape == (batch, 3), out.shape
    assert jnp.allclose(out, ref, atol=1e-5, rtol=1e-5), "mismatch vs reference"

    print("KERNEL_OK")
</pallas_src>

<mosaic_0001>
module attributes {stable_mosaic.version = 11 : i64} {
  func.func @mlp_kernel(%arg0: i32, %arg1: memref<104x4xf32, #tpu.memory_space<vmem>>, %arg2: memref<4x128xf32, #tpu.memory_space<vmem>>, %arg3: memref<1x128xf32, #tpu.memory_space<vmem>>, %arg4: memref<128x128xf32, #tpu.memory_space<vmem>>, %arg5: memref<1x128xf32, #tpu.memory_space<vmem>>, %arg6: memref<128x128xf32, #tpu.memory_space<vmem>>, %arg7: memref<1x128xf32, #tpu.memory_space<vmem>>, %arg8: memref<104x3xf32, #tpu.memory_space<vmem>>) attributes {dimension_semantics = [#tpu.dimension_semantics<parallel>], iteration_bounds = array<i64: 2>, scalar_prefetch = 0 : i64, scratch_operands = 0 : i64, tpu.core_type = #tpu.core_type<tc>, window_params = [{transform_indices = @transform_0, window_bounds = array<i64: 104, 4>}, {pipeline_mode = #tpu.pipeline_mode<synchronous>, transform_indices = @transform_1, window_bounds = array<i64: 4, 128>}, {pipeline_mode = #tpu.pipeline_mode<synchronous>, transform_indices = @transform_2, window_bounds = array<i64: 1, 128>}, {pipeline_mode = #tpu.pipeline_mode<synchronous>, transform_indices = @transform_3, window_bounds = array<i64: 128, 128>}, {pipeline_mode = #tpu.pipeline_mode<synchronous>, transform_indices = @transform_4, window_bounds = array<i64: 1, 128>}, {pipeline_mode = #tpu.pipeline_mode<synchronous>, transform_indices = @transform_5, window_bounds = array<i64: 128, 128>}, {pipeline_mode = #tpu.pipeline_mode<synchronous>, transform_indices = @transform_6, window_bounds = array<i64: 1, 128>}, {transform_indices = @transform_7, window_bounds = array<i64: 104, 3>}]} {
    %c0 = arith.constant 0 : index
    %c0_0 = arith.constant 0 : index
    %0 = vector.load %arg1[%c0, %c0_0] : memref<104x4xf32, #tpu.memory_space<vmem>>, vector<104x4xf32>
    %c0_1 = arith.constant 0 : index
    %c0_2 = arith.constant 0 : index
    %1 = vector.load %arg2[%c0_1, %c0_2] : memref<4x128xf32, #tpu.memory_space<vmem>>, vector<4x128xf32>
    %cst = arith.constant dense<0.000000e+00> : vector<104x128xf32>
    %2 = tpu.matmul %0, %1, %cst {dimension_numbers = #tpu.dot_dimension_numbers<[1], [0], [0], [1], [0, 0, 1, 1], [], []>} : vector<104x4xf32>, vector<4x128xf32>, vector<104x128xf32> -> vector<104x128xf32>
    %c0_3 = arith.constant 0 : index
    %c0_4 = arith.constant 0 : index
    %3 = vector.load %arg3[%c0_3, %c0_4] : memref<1x128xf32, #tpu.memory_space<vmem>>, vector<1x128xf32>
    %4 = vector.broadcast %3 : vector<1x128xf32> to vector<104x128xf32>
    %5 = arith.addf %2, %4 : vector<104x128xf32>
    %cst_5 = arith.constant 0.000000e+00 : f32
    %6 = vector.broadcast %cst_5 : f32 to vector<104x128xf32>
    %7 = arith.maximumf %5, %6 : vector<104x128xf32>
    %c0_6 = arith.constant 0 : index
    %c0_7 = arith.constant 0 : index
    %8 = vector.load %arg4[%c0_6, %c0_7] : memref<128x128xf32, #tpu.memory_space<vmem>>, vector<128x128xf32>
    %cst_8 = arith.constant dense<0.000000e+00> : vector<104x128xf32>
    %9 = tpu.matmul %7, %8, %cst_8 {dimension_numbers = #tpu.dot_dimension_numbers<[1], [0], [0], [1], [0, 0, 1, 1], [], []>} : vector<104x128xf32>, vector<128x128xf32>, vector<104x128xf32> -> vector<104x128xf32>
    %c0_9 = arith.constant 0 : index
    %c0_10 = arith.constant 0 : index
    %10 = vector.load %arg5[%c0_9, %c0_10] : memref<1x128xf32, #tpu.memory_space<vmem>>, vector<1x128xf32>
    %11 = vector.broadcast %10 : vector<1x128xf32> to vector<104x128xf32>
    %12 = arith.addf %9, %11 : vector<104x128xf32>
    %cst_11 = arith.constant 0.000000e+00 : f32
    %13 = vector.broadcast %cst_11 : f32 to vector<104x128xf32>
    %14 = arith.maximumf %12, %13 : vector<104x128xf32>
    %c0_12 = arith.constant 0 : index
    %c0_13 = arith.constant 0 : index
    %15 = vector.load %arg6[%c0_12, %c0_13] : memref<128x128xf32, #tpu.memory_space<vmem>>, vector<128x128xf32>
    %cst_14 = arith.constant dense<0.000000e+00> : vector<104x128xf32>
    %16 = tpu.matmul %14, %15, %cst_14 {dimension_numbers = #tpu.dot_dimension_numbers<[1], [0], [0], [1], [0, 0, 1, 1], [], []>} : vector<104x128xf32>, vector<128x128xf32>, vector<104x128xf32> -> vector<104x128xf32>
    %c0_15 = arith.constant 0 : index
    %c0_16 = arith.constant 0 : index
    %17 = vector.load %arg7[%c0_15, %c0_16] : memref<1x128xf32, #tpu.memory_space<vmem>>, vector<1x128xf32>
    %18 = vector.broadcast %17 : vector<1x128xf32> to vector<104x128xf32>
    %19 = arith.addf %16, %18 : vector<104x128xf32>
    %20 = vector.extract_strided_slice %19 {offsets = [0, 0], sizes = [104, 3], strides = [1, 1]} : vector<104x128xf32> to vector<104x3xf32>
    %c0_17 = arith.constant 0 : index
    %c0_18 = arith.constant 0 : index
    %21 = vector.load %arg8[%c0_17, %c0_18] : memref<104x3xf32, #tpu.memory_space<vmem>>, vector<104x3xf32>
    tpu.vector_store %arg8[%c0_17, %c0_18], %20 {strides = array<i32>} : memref<104x3xf32, #tpu.memory_space<vmem>>, vector<104x3xf32>,
    return
  }
  func.func @transform_0(%arg0: i32) -> (i32, i32) {
    %c0_i32 = arith.constant 0 : i32
    %c0_i32_0 = arith.constant 0 : i32
    return %arg0, %c0_i32 : i32, i32
  }
  func.func @transform_1(%arg0: i32) -> (i32, i32) {
    %c0_i32 = arith.constant 0 : i32
    %c0_i32_0 = arith.constant 0 : i32
    %c0_i32_1 = arith.constant 0 : i32
    return %c0_i32, %c0_i32_0 : i32, i32
  }
  func.func @transform_2(%arg0: i32) -> (i32, i32) {
    %c0_i32 = arith.constant 0 : i32
    %c0_i32_0 = arith.constant 0 : i32
    %c0_i32_1 = arith.constant 0 : i32
    return %c0_i32, %c0_i32_0 : i32, i32
  }
  func.func @transform_3(%arg0: i32) -> (i32, i32) {
    %c0_i32 = arith.constant 0 : i32
    %c0_i32_0 = arith.constant 0 : i32
    %c0_i32_1 = arith.constant 0 : i32
    return %c0_i32, %c0_i32_0 : i32, i32
  }
  func.func @transform_4(%arg0: i32) -> (i32, i32) {
    %c0_i32 = arith.constant 0 : i32
    %c0_i32_0 = arith.constant 0 : i32
    %c0_i32_1 = arith.constant 0 : i32
    return %c0_i32, %c0_i32_0 : i32, i32
  }
  func.func @transform_5(%arg0: i32) -> (i32, i32) {
    %c0_i32 = arith.constant 0 : i32
    %c0_i32_0 = arith.constant 0 : i32
    %c0_i32_1 = arith.constant 0 : i32
    return %c0_i32, %c0_i32_0 : i32, i32
  }
  func.func @transform_6(%arg0: i32) -> (i32, i32) {
    %c0_i32 = arith.constant 0 : i32
    %c0_i32_0 = arith.constant 0 : i32
    %c0_i32_1 = arith.constant 0 : i32
    return %c0_i32, %c0_i32_0 : i32, i32
  }
  func.func @transform_7(%arg0: i32) -> (i32, i32) {
    %c0_i32 = arith.constant 0 : i32
    %c0_i32_0 = arith.constant 0 : i32
    return %arg0, %c0_i32 : i32, i32
  }
}

module attributes {stable_mosaic.version = 11 : i64} {
  func.func @mlp_kernel(%arg0: i32, %arg1: memref<104x4xf32, #tpu.memory_space<vmem>>, %arg2: memref<4x128xf32, #tpu.memory_space<vmem>>, %arg3: memref<1x128xf32, #tpu.memory_space<vmem>>, %arg4: memref<128x128xf32, #tpu.memory_space<vmem>>, %arg5: memref<1x128xf32, #tpu.memory_space<vmem>>, %arg6: memref<128x128xf32, #tpu.memory_space<vmem>>, %arg7: memref<1x128xf32, #tpu.memory_space<vmem>>, %arg8: memref<104x3xf32, #tpu.memory_space<vmem>>) attributes {dimension_semantics = [#tpu.dimension_semantics<parallel>], iteration_bounds = array<i64: 2>, scalar_prefetch = 0 : i64, scratch_operands = 0 : i64, tpu.core_type = #tpu.core_type<tc>, window_params = [{transform_indices = @transform_0, window_bounds = array<i64: 104, 4>}, {pipeline_mode = #tpu.pipeline_mode<synchronous>, transform_indices = @transform_1, window_bounds = array<i64: 4, 128>}, {pipeline_mode = #tpu.pipeline_mode<synchronous>, transform_indices = @transform_2, window_bounds = array<i64: 1, 128>}, {pipeline_mode = #tpu.pipeline_mode<synchronous>, transform_indices = @transform_3, window_bounds = array<i64: 128, 128>}, {pipeline_mode = #tpu.pipeline_mode<synchronous>, transform_indices = @transform_4, window_bounds = array<i64: 1, 128>}, {pipeline_mode = #tpu.pipeline_mode<synchronous>, transform_indices = @transform_5, window_bounds = array<i64: 128, 128>}, {pipeline_mode = #tpu.pipeline_mode<synchronous>, transform_indices = @transform_6, window_bounds = array<i64: 1, 128>}, {transform_indices = @transform_7, window_bounds = array<i64: 104, 3>}]} {
    %c0 = arith.constant 0 : index
    %c0_0 = arith.constant 0 : index
    %0 = vector.load %arg1[%c0, %c0_0] : memref<104x4xf32, #tpu.memory_space<vmem>>, vector<104x4xf32>
    %c0_1 = arith.constant 0 : index
    %c0_2 = arith.constant 0 : index
    %1 = vector.load %arg2[%c0_1, %c0_2] : memref<4x128xf32, #tpu.memory_space<vmem>>, vector<4x128xf32>
    %cst = arith.constant dense<0.000000e+00> : vector<104x128xf32>
    %2 = tpu.matmul %0, %1, %cst {dimension_numbers = #tpu.dot_dimension_numbers<[1], [0], [0], [1], [0, 0, 1, 1], [], []>} : vector<104x4xf32>, vector<4x128xf32>, vector<104x128xf32> -> vector<104x128xf32>
    %c0_3 = arith.constant 0 : index
    %c0_4 = arith.constant 0 : index
    %3 = vector.load %arg3[%c0_3, %c0_4] : memref<1x128xf32, #tpu.memory_space<vmem>>, vector<1x128xf32>
    %4 = vector.broadcast %3 : vector<1x128xf32> to vector<104x128xf32>
    %5 = arith.addf %2, %4 : vector<104x128xf32>
    %cst_5 = arith.constant 0.000000e+00 : f32
    %6 = vector.broadcast %cst_5 : f32 to vector<104x128xf32>
    %7 = arith.maximumf %5, %6 : vector<104x128xf32>
    %c0_6 = arith.constant 0 : index
    %c0_7 = arith.constant 0 : index
    %8 = vector.load %arg4[%c0_6, %c0_7] : memref<128x128xf32, #tpu.memory_space<vmem>>, vector<128x128xf32>
    %cst_8 = arith.constant dense<0.000000e+00> : vector<104x128xf32>
    %9 = tpu.matmul %7, %8, %cst_8 {dimension_numbers = #tpu.dot_dimension_numbers<[1], [0], [0], [1], [0, 0, 1, 1], [], []>} : vector<104x128xf32>, vector<128x128xf32>, vector<104x128xf32> -> vector<104x128xf32>
    %c0_9 = arith.constant 0 : index
    %c0_10 = arith.constant 0 : index
    %10 = vector.load %arg5[%c0_9, %c0_10] : memref<1x128xf32, #tpu.memory_space<vmem>>, vector<1x128xf32>
    %11 = vector.broadcast %10 : vector<1x128xf32> to vector<104x128xf32>
    %12 = arith.addf %9, %11 : vector<104x128xf32>
    %cst_11 = arith.constant 0.000000e+00 : f32
    %13 = vector.broadcast %cst_11 : f32 to vector<104x128xf32>
    %14 = arith.maximumf %12, %13 : vector<104x128xf32>
    %c0_12 = arith.constant 0 : index
    %c0_13 = arith.constant 0 : index
    %15 = vector.load %arg6[%c0_12, %c0_13] : memref<128x128xf32, #tpu.memory_space<vmem>>, vector<128x128xf32>
    %cst_14 = arith.constant dense<0.000000e+00> : vector<104x128xf32>
    %16 = tpu.matmul %14, %15, %cst_14 {dimension_numbers = #tpu.dot_dimension_numbers<[1], [0], [0], [1], [0, 0, 1, 1], [], []>} : vector<104x128xf32>, vector<128x128xf32>, vector<104x128xf32> -> vector<104x128xf32>
    %c0_15 = arith.constant 0 : index
    %c0_16 = arith.constant 0 : index
    %17 = vector.load %arg7[%c0_15, %c0_16] : memref<1x128xf32, #tpu.memory_space<vmem>>, vector<1x128xf32>
    %18 = vector.broadcast %17 : vector<1x128xf32> to vector<104x128xf32>
    %19 = arith.addf %16, %18 : vector<104x128xf32>
    %20 = vector.extract_strided_slice %19 {offsets = [0, 0], sizes = [104, 3], strides = [1, 1]} : vector<104x128xf32> to vector<104x3xf32>
    %c0_17 = arith.constant 0 : index
    %c0_18 = arith.constant 0 : index
    %21 = vector.load %arg8[%c0_17, %c0_18] : memref<104x3xf32, #tpu.memory_space<vmem>>, vector<104x3xf32>
    tpu.vector_store %arg8[%c0_17, %c0_18], %20 {strides = array<i32>} : memref<104x3xf32, #tpu.memory_space<vmem>>, vector<104x3xf32>,
    return
  }
  func.func @transform_0(%arg0: i32) -> (i32, i32) {
    %c0_i32 = arith.constant 0 : i32
    %c0_i32_0 = arith.constant 0 : i32
    return %arg0, %c0_i32 : i32, i32
  }
  func.func @transform_1(%arg0: i32) -> (i32, i32) {
    %c0_i32 = arith.constant 0 : i32
    %c0_i32_0 = arith.constant 0 : i32
    %c0_i32_1 = arith.constant 0 : i32
    return %c0_i32, %c0_i32_0 : i32, i32
  }
  func.func @transform_2(%arg0: i32) -> (i32, i32) {
    %c0_i32 = arith.constant 0 : i32
    %c0_i32_0 = arith.constant 0 : i32
    %c0_i32_1 = arith.constant 0 : i32
    return %c0_i32, %c0_i32_0 : i32, i32
  }
  func.func @transform_3(%arg0: i32) -> (i32, i32) {
    %c0_i32 = arith.constant 0 : i32
    %c0_i32_0 = arith.constant 0 : i32
    %c0_i32_1 = arith.constant 0 : i32
    return %c0_i32, %c0_i32_0 : i32, i32
  }
  func.func @transform_4(%arg0: i32) -> (i32, i32) {
    %c0_i32 = arith.constant 0 : i32
    %c0_i32_0 = arith.constant 0 : i32
    %c0_i32_1 = arith.constant 0 : i32
    return %c0_i32, %c0_i32_0 : i32, i32
  }
  func.func @transform_5(%arg0: i32) -> (i32, i32) {
    %c0_i32 = arith.constant 0 : i32
    %c0_i32_0 = arith.constant 0 : i32
    %c0_i32_1 = arith.constant 0 : i32
    return %c0_i32, %c0_i32_0 : i32, i32
  }
  func.func @transform_6(%arg0: i32) -> (i32, i32) {
    %c0_i32 = arith.constant 0 : i32
    %c0_i32_0 = arith.constant 0 : i32
    %c0_i32_1 = arith.constant 0 : i32
    return %c0_i32, %c0_i32_0 : i32, i32
  }
  func.func @transform_7(%arg0: i32) -> (i32, i32) {
    %c0_i32 = arith.constant 0 : i32
    %c0_i32_0 = arith.constant 0 : i32
    return %arg0, %c0_i32 : i32, i32
  }
}

</mosaic_0001>

<bundles_post_ra>
// kernel: tpu_custom_call.1
= control target key start
LH: loop header
LB: loop body
LE: loop exit
PB: predicated region body
PF: predicated region fallthrough
CT: control target
= control target key end

     0   :  { %12 = vsyncpa [#allocation3], 0  ;;  %s1248_s24 = smov 0   ;;  %s1250_s25 = smov 0   ;;  %s1520_s0 = inlined_call_operand.vmem [shape: f32[200,4], index: 0, kind: input, shape index: {}]   ;;  %s1521_s1 = inlined_call_operand.vmem [shape: f32[4,128], index: 1, kind: input, shape index: {}]   ;;  %s1522_s2 = inlined_call_operand.vmem [shape: f32[1,128], index: 2, kind: input, shape index: {}]   ;;  %s1523_s3 = inlined_call_operand.vmem [shape: f32[128,128], index: 3, kind: input, shape index: {}]   ;;  %s1524_s4 = inlined_call_operand.vmem [shape: f32[1,128], index: 4, kind: input, shape index: {}]   ;;  %s1525_s5 = inlined_call_operand.hbm [shape: f32[128,128], index: 5, kind: input, shape index: {}]   ;;  %s1526_s6 = inlined_call_operand.vmem [shape: f32[1,128], index: 6, kind: input, shape index: {}]   ;;  %s1527_s7 = inlined_call_operand.vmem [shape: f32[200,3], index: 7, kind: output, shape index: {}]  }
   0x1   :  { %s1252_s26 = smov 0  }
   0x2 LB: > { %s1261_s27 = sadd.s32 4294967295, %s1171_s26   ;;  %s1263_s28 = sadd.s32 1, %s1171_s26   ;;  %s1171_s26 = sphi %s1252_s26, %s1536_s26   ;;  %s1167_s25 = sphi %s1250_s25, %s1535_s25   ;;  %s1163_s24 = sphi %s1248_s24, %s1534_s24  }
   0x3   : > { %s174_s29 = ssub.s32 %s1171_s26, %s1263_s28  ;;  %s177_s30 = sadd.s32 1, %s1167_s25 }
   0x4   : > { %p175_p0 = scmp.eq.s32.totalorder %s174_s29, 0  ;;  %p187_p1 = scmp.ne.s32.totalorder %s1167_s25, %s1163_s24 }
   0x5   : > { %p188_p2 = scmp.eq.s32.totalorder %s1261_s27, 1  ;;  %p906_p3 = scmp.ge.s32.totalorder %s1171_s26, 1 }
   0x6   : > { %s1271_s8 = scalar_select %p175_p0, %s1167_s25, %s177_s30  }
   0x7   : > { %p1273_p4 = por %p188_p2, %p187_p1  ;;  %p201_p5 = scmp.lt.s32.totalorder %s1171_s26, 3 }
   0x8   : > { %p980_p6 = scmp.eq.s32.totalorder %s1261_s27, 0  ;;  %s224_s12 = sshll.u32 %s1525_s5, 4  ;;  %s225_s12 = int_to_ptr.hbm [resolvable:$true] %s224_s12 }
   0x9   : > { %p202_p7 = pnand %p906_p3, %p201_p5  ;;  %s1205_s13 = smov [#allocation2]  }
   0xa   : > { %s226_s14 = sshll.u32 %s1205_s13, 4  ;;  %s1206_s15 = smov 128   ;;  %s227_s14 = int_to_ptr.vmem [resolvable:$true] %s226_s14 }
   0xb   : > { %p976_p8 = pneg %p202_p7  ;;  %s1207_s16 = smov 8  }
   0xc   : > { %262 = sbr.rel (%p202_p7) target bundleno = 584 (0x248), region = 48 }
   0xd   : > { %p977_p9 = pnand %p980_p6, %p976_p8 }
   0xf   : > { %979 = dma.hbm_to_vmem [thread:$0]  (!%p977_p9), %s225_s12, 2048, %s227_s14, [#allocation3], %s1206_s15, %s1206_s15, %s1207_s16  }
  0x11   : > { %1158 = dma.done.wait (%p980_p6), [#allocation3], 2048  }
  0x12   : > { %1160 = vsyncadd (%p980_p6), [#allocation3], 4294965248  ;;  %s1288_s17 = smul.u32 13, %s1261_s27  ;;  %vm375_vm0 = vcmask 1043456   ;;  %vm335_vm1 = vcmask 31744   ;;  %v463_v10 = vld [vmem:[%s1523_s3 + $0x78] sm:$0xff] }
  0x13   : > { %v330_v0 = vld [vmem:[%s1521_s1] sm:$0xf]  ;;  %v462_v11 = vld [vmem:[%s1523_s3 + $0x70] sm:$0xff]  ;;  %468 = vmatpush.msra.mxu1 %v463_v10  ;;  %939 = vmatpush.msra.mxu3 %v463_v10  ;;  %v461_v12 = vld [vmem:[%s1523_s3 + $0x68] sm:$0xff]  ;;  %s295_s13 = sand.u32 1, %s1163_s24   ;;  %vm613_vm2 = vcmask 23552  }
  0x14   : > { %p303_p10 = scmp.lt.s32.totalorder %s1288_s17, 24  ;;  %912 = vmatpush.msk.msra.mxu0 %vm375_vm0, %v330_v0  ;;  %v460_v13 = vld [vmem:[%s1523_s3 + $0x60] sm:$0xff]  ;;  %v459_v15 = vld [vmem:[%s1523_s3 + $0x58] sm:$0xff]  ;;  %v458_v16 = vld [vmem:[%s1523_s3 + $0x50] sm:$0xff]  ;;  %s971_s14 = smul.u32 104, %s295_s13 }
  0x15   : > { %469 = vmatpush.msra.mxu1 %v462_v11  ;;  %940 = vmatpush.msra.mxu3 %v462_v11  ;;  %v457_v17 = vld [vmem:[%s1523_s3 + $0x48] sm:$0xff]  ;;  %v456_v18 = vld [vmem:[%s1523_s3 + $0x40] sm:$0xff]  ;;  %v455_v20 = vld [vmem:[%s1523_s3 + $0x38] sm:$0xff]  ;;  %s635_s24 = ssub.s32 (%p1273_p4), 25, %s1288_s17 }
  0x16   : > { %s304_s18 = scalar_select %p303_p10, %s1288_s17, 24  ;;  %v454_v21 = vld [vmem:[%s1523_s3 + $0x30] sm:$0xff]  ;;  %v453_v22 = vld [vmem:[%s1523_s3 + $0x28] sm:$0xff]  ;;  %v452_v23 = vld [vmem:[%s1523_s3 + $0x20] sm:$0xff] }
  0x17   : > { %470 = vmatpush.msra.mxu1 %v461_v12  ;;  %941 = vmatpush.msra.mxu3 %v461_v12  ;;  %v451_v25 = vld [vmem:[%s1523_s3 + $0x18] sm:$0xff]  ;;  %v450_v26 = vld [vmem:[%s1523_s3 + $0x10] sm:$0xff]  ;;  %v449_v28 = vld [vmem:[%s1523_s3 + $0x8] sm:$0xff]  ;;  %p636_p11 = scmp.lt.s32.totalorder (%p1273_p4), %s635_s24, 13 }
  0x18   : > { %s911_s19 = sshll.u32 %s304_s18, 3  ;;  %v448_v29 = vld [vmem:[%s1523_s3] sm:$0xff]  ;;  %v552_v58 = vld [vmem:[#allocation2 + $0x78] sm:$0xff]  ;;  %v551_v59 = vld [vmem:[#allocation2 + $0x70] sm:$0xff]  ;;  %s1399_s18 = scalar_lea.vmem [#allocation4], %s971_s14  }
  0x19   : > { %s1298_s26 = scalar_lea.vmem %s1520_s0, %s911_s19  ;;  %471 = vmatpush.msra.mxu1 %v460_v13  ;;  %942 = vmatpush.msra.mxu3 %v460_v13  ;;  %v1377_v30 = vld [vmem:[%s1522_s2] ss:$0 sm:$0xff]  ;;  %v550_v60 = vld [vmem:[#allocation2 + $0x68] sm:$0xff]  ;;  %s938_s19 = smul.u32 (%p1273_p4), 104, %s1261_s27 }
  0x1a   : > { %v317_v1 = vld [vmem:[%s1298_s26] sm:$0xff]  ;;  %v318_v2 = vld [vmem:[%s1298_s26 + $0x8] sm:$0xff]  ;;  %v319_v3 = vld [vmem:[%s1298_s26 + $0x10] sm:$0xff]  ;;  %557 = vmatpush.msra.mxu2 %v552_v58 }
  0x1b   : > { %913 = vmatmul.msk.f32.vlgmr.msra.gmra.mxu0 %vm335_vm1, %v317_v1  ;;  %v320_v4 = vld [vmem:[%s1298_s26 + $0x18] sm:$0xff]  ;;  %v321_v5 = vld [vmem:[%s1298_s26 + $0x20] sm:$0xff]  ;;  %v322_v6 = vld [vmem:[%s1298_s26 + $0x28] sm:$0xff]  ;;  %472 = vmatpush.msra.mxu1 %v459_v15  ;;  %s1434_s22 = scalar_lea.vmem (%p1273_p4), %s1527_s7, %s938_s19  }
  0x1c   : > { %v323_v7 = vld [vmem:[%s1298_s26 + $0x30] sm:$0xff]  ;;  %v324_v8 = vld [vmem:[%s1298_s26 + $0x38] sm:$0xff]  ;;  %v325_v9 = vld [vmem:[%s1298_s26 + $0x40] sm:$0xff]  ;;  %943 = vmatpush.msra.mxu3 %v459_v15  ;;  %558 = vmatpush.msra.mxu2 %v551_v59 }
  0x1d   : > { %v326_v14 = vld [vmem:[%s1298_s26 + $0x48] sm:$0xff]  ;;  %473 = vmatpush.msra.mxu1 %v458_v16  ;;  %v327_v19 = vld [vmem:[%s1298_s26 + $0x50] sm:$0xff]  ;;  %v328_v24 = vld [vmem:[%s1298_s26 + $0x58] sm:$0xff] }
  0x1e   : > { %944 = vmatpush.msra.mxu3 %v458_v16  ;;  %v329_v27 = vld [vmem:[%s1298_s26 + $0x60] sm:$0xff]  ;;  %559 = vmatpush.msra.mxu2 %v550_v60  ;;  %v548_v1 = vld [vmem:[#allocation2 + $0x58] sm:$0xff]  ;;  %v542_v10 = vld [vmem:[#allocation2 + $0x28] sm:$0xff] }
  0x1f   : > { %474 = vmatpush.msra.mxu1 %v457_v17  ;;  %v549_v63 = vld [vmem:[#allocation2 + $0x60] sm:$0xff]  ;;  %v540_v15 = vld [vmem:[#allocation2 + $0x18] sm:$0xff] }
  0x20   : > { %945 = vmatpush.msra.mxu3 %v457_v17  ;;  %560 = vmatpush.msra.mxu2 %v549_v63  ;;  %v541_v13 = vld [vmem:[#allocation2 + $0x20] sm:$0xff] }
  0x21   : > { %475 = vmatpush.msra.mxu1 %v456_v18 }
  0x22   : > { %946 = vmatpush.msra.mxu3 %v456_v18  ;;  %561 = vmatpush.msra.mxu2 %v548_v1  ;;  %v539_v18 = vld [vmem:[#allocation2 + $0x10] sm:$0xff] }
  0x23   : > { %914 = vmatmul.msk.f32.gmra.mxu0 %vm335_vm1, %v318_v2  ;;  %476 = vmatpush.msra.mxu1 %v455_v20  ;;  %v547_v2 = vld [vmem:[#allocation2 + $0x50] sm:$0xff] }
  0x24   : > { %947 = vmatpush.msra.mxu3 %v455_v20  ;;  %562 = vmatpush.msra.mxu2 %v547_v2  ;;  %v538_v20 = vld [vmem:[#allocation2 + $0x8] sm:$0xff] }
  0x25   : > { %477 = vmatpush.msra.mxu1 %v454_v21 }
  0x26   : > { %948 = vmatpush.msra.mxu3 %v454_v21  ;;  %v537_v21 = vld [vmem:[#allocation2] sm:$0xff] }
  0x27   : > { %478 = vmatpush.msra.mxu1 %v453_v22 }
  0x28   : > { %949 = vmatpush.msra.mxu3 %v453_v22  ;;  %v1075_v22 = vld [vmem:[%s1524_s4] ss:$0 sm:$0xff] }
  0x29   : > { %479 = vmatpush.msra.mxu1 %v452_v23 }
  0x2a   : > { %950 = vmatpush.msra.mxu3 %v452_v23 }
  0x2b   : > { %915 = vmatmul.msk.f32.gmra.mxu0 %vm335_vm1, %v319_v3  ;;  %480 = vmatpush.msra.mxu1 %v451_v25  ;;  %v546_v3 = vld [vmem:[#allocation2 + $0x48] sm:$0xff] }
  0x2c   : > { %951 = vmatpush.msra.mxu3 %v451_v25  ;;  %563 = vmatpush.msra.mxu2 %v546_v3 }
  0x2d   : > { %481 = vmatpush.msra.mxu1 %v450_v26 }
  0x2e   : > { %952 = vmatpush.msra.mxu3 %v450_v26 }
  0x2f   : > { %482 = vmatpush.msra.mxu1 %v449_v28 }
  0x30   : > { %953 = vmatpush.msra.mxu3 %v449_v28 }
  0x31   : > { %483 = vmatpush.msra.mxu1 %v448_v29 }
  0x32   : > { %954 = vmatpush.msra.mxu3 %v448_v29 }
  0x33   : > { %916 = vmatmul.msk.f32.gmra.mxu0 %vm335_vm1, %v320_v4 }
  0x34   : > { %955 = vmatpush.msrb.mxu3 %v552_v58 }
  0x36   : > { %956 = vmatpush.msrb.mxu3 %v551_v59 }
  0x38   : > { %957 = vmatpush.msrb.mxu3 %v550_v60 }
  0x3a   : > { %958 = vmatpush.msrb.mxu3 %v549_v63 }
  0x3b   : > { %917 = vmatmul.msk.f32.gmra.mxu0 %vm335_vm1, %v321_v5 }
  0x3c   : > { %959 = vmatpush.msrb.mxu3 %v548_v1 }
  0x3e   : > { %960 = vmatpush.msrb.mxu3 %v547_v2 }
  0x40   : > { %961 = vmatpush.msrb.mxu3 %v546_v3 }
  0x43   : > { %918 = vmatmul.msk.f32.gmra.mxu0 %vm335_vm1, %v322_v6  ;;  %v545_v6 = vld [vmem:[#allocation2 + $0x40] sm:$0xff] }
  0x44   : > { %564 = vmatpush.msra.mxu2 %v545_v6  ;;  %962 = vmatpush.msrb.mxu3 %v545_v6 }
  0x4b   : > { %919 = vmatmul.msk.f32.gmra.mxu0 %vm335_vm1, %v323_v7 }
  0x53   : > { %920 = vmatmul.msk.f32.gmra.mxu0 %vm335_vm1, %v324_v8  ;;  %v544_v8 = vld [vmem:[#allocation2 + $0x38] sm:$0xff] }
  0x54   : > { %565 = vmatpush.msra.mxu2 %v544_v8  ;;  %963 = vmatpush.msrb.mxu3 %v544_v8 }
  0x5b   : > { %921 = vmatmul.msk.f32.gmra.mxu0 %vm335_vm1, %v325_v9  ;;  %v543_v9 = vld [vmem:[#allocation2 + $0x30] sm:$0xff] }
  0x5c   : > { %566 = vmatpush.msra.mxu2 %v543_v9  ;;  %964 = vmatpush.msrb.mxu3 %v543_v9 }
  0x5e   : > { %567 = vmatpush.msra.mxu2 %v542_v10  ;;  %965 = vmatpush.msrb.mxu3 %v542_v10 }
  0x60   : > { %568 = vmatpush.msra.mxu2 %v541_v13  ;;  %966 = vmatpush.msrb.mxu3 %v541_v13 }
  0x62   : > { %569 = vmatpush.msra.mxu2 %v540_v15  ;;  %967 = vmatpush.msrb.mxu3 %v540_v15 }
  0x63   : > { %922 = vmatmul.msk.f32.gmra.mxu0 %vm335_vm1, %v326_v14 }
  0x64   : > { %570 = vmatpush.msra.mxu2 %v539_v18  ;;  %968 = vmatpush.msrb.mxu3 %v539_v18 }
  0x66   : > { %571 = vmatpush.msra.mxu2 %v538_v20  ;;  %969 = vmatpush.msrb.mxu3 %v538_v20 }
  0x68   : > { %572 = vmatpush.msra.mxu2 %v537_v21  ;;  %970 = vmatpush.msrb.mxu3 %v537_v21 }
  0x6b   : > { %923 = vmatmul.msk.f32.gmra.mxu0 %vm335_vm1, %v327_v19 }
  0x73   : > { %924 = vmatmul.msk.f32.gmra.mxu0 %vm335_vm1, %v328_v24 }
  0x7b   : > { %925 = vmatmul.msk.f32.gmra.mxu0 %vm335_vm1, %v329_v27 }
  0x98   : > { %v396_v31 = vpop.f32.mrf.mxu0 }
  0x99   : > { %v397_v32 = vadd.f32 %v1377_v30, %v396_v31 }
  0x9b   : > { %v435_v33 = vmax.f32 %v397_v32, 0.0 }
  0x9d   : > { %484 = vmatmul.f32.vlgmr.msra.gmra.mxu1 %v435_v33 }
  0xa0   : > { %v399_v34 = vpop.f32.mrf.mxu0 }
  0xa1   : > { %v400_v35 = vadd.f32 %v1377_v30, %v399_v34 }
  0xa3   : > { %v436_v36 = vmax.f32 %v400_v35, 0.0 }
  0xa5   : > { %487 = vmatmul.f32.gmra.mxu1 %v436_v36 }
  0xa8   : > { %v402_v37 = vpop.f32.mrf.mxu0 }
  0xa9   : > { %v403_v38 = vadd.f32 %v1377_v30, %v402_v37 }
  0xab   : > { %v437_v39 = vmax.f32 %v403_v38, 0.0 }
  0xad   : > { %490 = vmatmul.f32.gmra.mxu1 %v437_v39 }
  0xb0   : > { %v405_v40 = vpop.f32.mrf.mxu0 }
  0xb1   : > { %v406_v41 = vadd.f32 %v1377_v30, %v405_v40 }
  0xb3   : > { %v438_v42 = vmax.f32 %v406_v41, 0.0 }
  0xb5   : > { %493 = vmatmul.f32.gmra.mxu1 %v438_v42 }
  0xb8   : > { %v408_v43 = vpop.f32.mrf.mxu0 }
  0xb9   : > { %v409_v44 = vadd.f32 %v1377_v30, %v408_v43 }
  0xbb   : > { %v439_v45 = vmax.f32 %v409_v44, 0.0 }
  0xbd   : > { %496 = vmatmul.f32.gmra.mxu1 %v439_v45 }
  0xc0   : > { %v411_v46 = vpop.f32.mrf.mxu0 }
  0xc1   : > { %v412_v47 = vadd.f32 %v1377_v30, %v411_v46 }
  0xc3   : > { %v440_v48 = vmax.f32 %v412_v47, 0.0 }
  0xc5   : > { %499 = vmatmul.f32.gmra.mxu1 %v440_v48 }
  0xc8   : > { %v414_v49 = vpop.f32.mrf.mxu0 }
  0xc9   : > { %v415_v50 = vadd.f32 %v1377_v30, %v414_v49 }
  0xcb   : > { %v441_v51 = vmax.f32 %v415_v50, 0.0 }
  0xcd   : > { %502 = vmatmul.f32.gmra.mxu1 %v441_v51 }
  0xd0   : > { %v417_v52 = vpop.f32.mrf.mxu0 }
  0xd1   : > { %v418_v53 = vadd.f32 %v1377_v30, %v417_v52 }
  0xd3   : > { %v442_v54 = vmax.f32 %v418_v53, 0.0 }
  0xd5   : > { %505 = vmatmul.f32.gmra.mxu1 %v442_v54 }
  0xd8   : > { %v420_v55 = vpop.f32.mrf.mxu0 }
  0xd9   : > { %v421_v56 = vadd.f32 %v1377_v30, %v420_v55 }
  0xdb   : > { %v443_v57 = vmax.f32 %v421_v56, 0.0 }
  0xdd   : > { %508 = vmatmul.f32.gmra.mxu1 %v443_v57 }
  0xe0   : > { %v423_v61 = vpop.f32.mrf.mxu0 }
  0xe1   : > { %v424_v62 = vadd.f32 %v1377_v30, %v423_v61 }
  0xe3   : > { %v444_v0 = vmax.f32 %v424_v62, 0.0  ;;  %v1076_v62 = vld [vmem:[%s1526_s6] ss:$0 sm:$0xff] }
  0xe5   : > { %511 = vmatmul.f32.vlgmr.msra.gmra.mxu3 %v444_v0 }
  0xe8   : > { %v426_v4 = vpop.f32.mrf.mxu0 }
  0xe9   : > { %v427_v5 = vadd.f32 %v1377_v30, %v426_v4 }
  0xeb   : > { %v445_v7 = vmax.f32 %v427_v5, 0.0 }
  0xed   : > { %514 = vmatmul.f32.gmra.mxu3 %v445_v7 }
  0xf0   : > { %v429_v11 = vpop.f32.mrf.mxu0 }
  0xf1   : > { %v430_v12 = vadd.f32 %v1377_v30, %v429_v11 }
  0xf3   : > { %v446_v14 = vmax.f32 %v430_v12, 0.0 }
  0xf5   : > { %517 = vmatmul.f32.gmra.mxu3 %v446_v14 }
  0xf8   : > { %v432_v16 = vpop.f32.mrf.mxu0 }
  0xf9   : > { %v433_v17 = vadd.f32 %v1377_v30, %v432_v16 }
  0xfb   : > { %v447_v19 = vmax.f32 %v433_v17, 0.0 }
  0xfd   : > { %520 = vmatmul.f32.gmra.mxu3 %v447_v19 }
 0x11a   : > { %v485_v23 = vpop.f32.mrf.mxu1 }
 0x11b   : > { %v486_v24 = vadd.f32 %v1075_v22, %v485_v23 }
 0x11d   : > { %v524_v25 = vmax.f32 %v486_v24, 0.0 }
 0x11f   : > { %573 = vmatmul.f32.vlgmr.msra.gmra.mxu2 %v524_v25 }
 0x122   : > { %v488_v26 = vpop.f32.mrf.mxu1 }
 0x123   : > { %v489_v27 = vadd.f32 %v1075_v22, %v488_v26 }
 0x125   : > { %v525_v28 = vmax.f32 %v489_v27, 0.0 }
 0x127   : > { %576 = vmatmul.f32.gmra.mxu2 %v525_v28 }
 0x12a   : > { %v491_v29 = vpop.f32.mrf.mxu1 }
 0x12b   : > { %v492_v30 = vadd.f32 %v1075_v22, %v491_v29 }
 0x12d   : > { %v526_v31 = vmax.f32 %v492_v30, 0.0 }
 0x12f   : > { %579 = vmatmul.f32.gmra.mxu2 %v526_v31 }
 0x132   : > { %v494_v32 = vpop.f32.mrf.mxu1 }
 0x133   : > { %v495_v33 = vadd.f32 %v1075_v22, %v494_v32 }
 0x135   : > { %v527_v34 = vmax.f32 %v495_v33, 0.0 }
 0x137   : > { %582 = vmatmul.f32.gmra.mxu2 %v527_v34 }
 0x13a   : > { %v497_v35 = vpop.f32.mrf.mxu1 }
 0x13b   : > { %v498_v36 = vadd.f32 %v1075_v22, %v497_v35 }
 0x13d   : > { %v528_v37 = vmax.f32 %v498_v36, 0.0 }
 0x13f   : > { %585 = vmatmul.f32.gmra.mxu2 %v528_v37 }
 0x142   : > { %v500_v38 = vpop.f32.mrf.mxu1 }
 0x143   : > { %v501_v39 = vadd.f32 %v1075_v22, %v500_v38 }
 0x145   : > { %v529_v40 = vmax.f32 %v501_v39, 0.0 }
 0x147   : > { %588 = vmatmul.f32.gmra.mxu2 %v529_v40 }
 0x14a   : > { %v503_v41 = vpop.f32.mrf.mxu1 }
 0x14b   : > { %v504_v42 = vadd.f32 %v1075_v22, %v503_v41 }
 0x14d   : > { %v530_v43 = vmax.f32 %v504_v42, 0.0 }
 0x14f   : > { %591 = vmatmul.f32.gmra.mxu2 %v530_v43 }
 0x152   : > { %v506_v44 = vpop.f32.mrf.mxu1 }
 0x153   : > { %v507_v45 = vadd.f32 %v1075_v22, %v506_v44 }
 0x155   : > { %v531_v46 = vmax.f32 %v507_v45, 0.0 }
 0x157   : > { %594 = vmatmul.f32.gmra.mxu2 %v531_v46 }
 0x15a   : > { %v509_v47 = vpop.f32.mrf.mxu1 }
 0x15b   : > { %v510_v48 = vadd.f32 %v1075_v22, %v509_v47 }
 0x15d   : > { %v532_v49 = vmax.f32 %v510_v48, 0.0 }
 0x15f   : > { %597 = vmatmul.f32.gmra.mxu2 %v532_v49 }
 0x168   : > { %v512_v50 = vpop.f32.mrf.mxu3 }
 0x169   : > { %v513_v51 = vadd.f32 %v1075_v22, %v512_v50 }
 0x16b   : > { %v533_v52 = vmax.f32 %v513_v51, 0.0 }
 0x16d   : > { %600 = vmatmul.f32.vlgmr.msrb.gmra.mxu3 %v533_v52 }
 0x170   : > { %v515_v53 = vpop.f32.mrf.mxu3 }
 0x171   : > { %v516_v54 = vadd.f32 %v1075_v22, %v515_v53 }
 0x173   : > { %v534_v55 = vmax.f32 %v516_v54, 0.0 }
 0x175   : > { %603 = vmatmul.f32.gmra.mxu3 %v534_v55 }
 0x178   : > { %v518_v56 = vpop.f32.mrf.mxu3 }
 0x179   : > { %v519_v57 = vadd.f32 %v1075_v22, %v518_v56 }
 0x17b   : > { %v535_v58 = vmax.f32 %v519_v57, 0.0 }
 0x17d   : > { %606 = vmatmul.f32.gmra.mxu3 %v535_v58 }
 0x180   : > { %v521_v59 = vpop.f32.mrf.mxu3 }
 0x181   : > { %v522_v60 = vadd.f32 %v1075_v22, %v521_v59 }
 0x183   : > { %v536_v61 = vmax.f32 %v522_v60, 0.0 }
 0x185   : > { %609 = vmatmul.f32.gmra.mxu3 %v536_v61 }
 0x1a2   : > { %v574_v63 = vpop.f32.mrf.mxu2 }
 0x1a3   : > { %v575_v0 = vadd.f32 %v1076_v62, %v574_v63 }
 0x1a5   : > { %614 = vst.msk [vmem:[%s1399_s18] sm:$0xff] %vm613_vm2, %v575_v0 }
 0x1aa   : > { %v577_v1 = vpop.f32.mrf.mxu2 }
 0x1ab   : > { %v578_v2 = vadd.f32 %v1076_v62, %v577_v1 }
 0x1ad   : > { %615 = vst.msk [vmem:[%s1399_s18 + $0x8] sm:$0xff] %vm613_vm2, %v578_v2 }
 0x1b2   : > { %v580_v3 = vpop.f32.mrf.mxu2 }
 0x1b3   : > { %v581_v4 = vadd.f32 %v1076_v62, %v580_v3 }
 0x1b5   : > { %616 = vst.msk [vmem:[%s1399_s18 + $0x10] sm:$0xff] %vm613_vm2, %v581_v4 }
 0x1ba   : > { %v583_v5 = vpop.f32.mrf.mxu2 }
 0x1bb   : > { %v584_v6 = vadd.f32 %v1076_v62, %v583_v5 }
 0x1bd   : > { %617 = vst.msk [vmem:[%s1399_s18 + $0x18] sm:$0xff] %vm613_vm2, %v584_v6 }
 0x1c2   : > { %v586_v7 = vpop.f32.mrf.mxu2 }
 0x1c3   : > { %v587_v8 = vadd.f32 %v1076_v62, %v586_v7 }
 0x1c5   : > { %618 = vst.msk [vmem:[%s1399_s18 + $0x20] sm:$0xff] %vm613_vm2, %v587_v8 }
 0x1ca   : > { %v589_v9 = vpop.f32.mrf.mxu2 }
 0x1cb   : > { %v590_v10 = vadd.f32 %v1076_v62, %v589_v9 }
 0x1cd   : > { %619 = vst.msk [vmem:[%s1399_s18 + $0x28] sm:$0xff] %vm613_vm2, %v590_v10 }
 0x1d2   : > { %v592_v11 = vpop.f32.mrf.mxu2 }
 0x1d3   : > { %v593_v12 = vadd.f32 %v1076_v62, %v592_v11 }
 0x1d5   : > { %620 = vst.msk [vmem:[%s1399_s18 + $0x30] sm:$0xff] %vm613_vm2, %v593_v12 }
 0x1da   : > { %v595_v13 = vpop.f32.mrf.mxu2 }
 0x1db   : > { %v596_v14 = vadd.f32 %v1076_v62, %v595_v13 }
 0x1dd   : > { %621 = vst.msk [vmem:[%s1399_s18 + $0x38] sm:$0xff] %vm613_vm2, %v596_v14 }
 0x1e2   : > { %v598_v15 = vpop.f32.mrf.mxu2 }
 0x1e3   : > { %v599_v16 = vadd.f32 %v1076_v62, %v598_v15 }
 0x1e5   : > { %622 = vst.msk [vmem:[%s1399_s18 + $0x40] sm:$0xff] %vm613_vm2, %v599_v16 }
 0x1f0   : > { %v601_v17 = vpop.f32.mrf.mxu3 }
 0x1f1   : > { %v602_v18 = vadd.f32 %v1076_v62, %v601_v17 }
 0x1f3   : > { %623 = vst.msk [vmem:[%s1399_s18 + $0x48] sm:$0xff] %vm613_vm2, %v602_v18 }
 0x1f8   : > { %v604_v19 = vpop.f32.mrf.mxu3 }
 0x1f9   : > { %v605_v20 = vadd.f32 %v1076_v62, %v604_v19 }
 0x1fb   : > { %624 = vst.msk [vmem:[%s1399_s18 + $0x50] sm:$0xff] %vm613_vm2, %v605_v20 }
 0x200   : > { %v607_v21 = vpop.f32.mrf.mxu3 }
 0x201   : > { %v608_v22 = vadd.f32 %v1076_v62, %v607_v21 }
 0x203   : > { %625 = vst.msk [vmem:[%s1399_s18 + $0x58] sm:$0xff] %vm613_vm2, %v608_v22 }
 0x207   : > { %633 = sbr.rel (!%p1273_p4) target bundleno = 584 (0x248), region = 56 }
 0x208   : > { %v610_v23 = vpop.f32.mrf.mxu3 }
 0x209   : > { %v611_v24 = vadd.f32 %v1076_v62, %v610_v23 }
 0x20b   : > { %626 = vst.msk [vmem:[%s1399_s18 + $0x60] sm:$0xff] %vm613_vm2, %v611_v24 }
 0x20c   : > { %s1538_s24 = smov (!%p636_p11, %s635_s24), 13 }
 0x20d   : > { %s926_s23 = sshll.u32 %s1538_s24, 3 }
 0x20e   : > { %p929_p12 = scmp.eq.s32.totalorder %s926_s23, 0 }
 0x20f   : > { %1077 = sdivrem.u32 (!%p929_p12), %s1538_s24, 13 }
 0x210   : > { %644 = sbr.rel (%p929_p12) target bundleno = 584 (0x248), region = 60 }
 0x218   : > { %s1440_s9 = spop.drf %1077 }
 0x219   : > { %s1079_s29 = spop.drf %1077  ;;  %p930_p13 = scmp.le.s32.totalorder %s1440_s9, 0 }
 0x21a   : > { %s1529_s27 = smov (!%p930_p13), %s1434_s22  ;;  %s1530_s17 = smov (!%p930_p13), %s1399_s18 }
 0x21b   : > { %852 = sbr.rel (%p930_p13) target bundleno = 558 (0x22e), region = 137  ;;  %s1449_s30 = smov (!%p930_p13), 0  }
 0x21c   : > { %s1451_s10 = smov (!%p930_p13), 0  }
 0x220 LB: >> { %v733_v25 = vld [vmem:[%s1179_s17] sm:$0xff]  ;;  %v735_v26 = vld [vmem:[%s1179_s17 + $0x8] sm:$0xff]  ;;  %v737_v27 = vld [vmem:[%s1179_s17 + $0x10] sm:$0xff]  ;;  %s759_s11 = sadd.s32 1, %s1183_s30  ;;  %s727_s10 = sadd.s32 1, %s1187_s10   ;;  %s1187_s10 = sphi %s1451_s10, %s727_s10   ;;  %s1183_s30 = sphi %s1449_s30, %s1533_s30   ;;  %s1179_s17 = sphi %s1530_s17, %s1532_s17   ;;  %s1175_s27 = sphi %s1529_s27, %s1531_s27  }
 0x221   : >> { %734 = vst [vmem:[%s1175_s27] sm:$0xff] %v733_v25  ;;  %v739_v28 = vld [vmem:[%s1179_s17 + $0x18] sm:$0xff]  ;;  %p760_p0 = scmp.ge.s32.totalorder %s759_s11, %s1440_s9  ;;  %v741_v29 = vld [vmem:[%s1179_s17 + $0x20] sm:$0xff]  ;;  %v743_v30 = vld [vmem:[%s1179_s17 + $0x28] sm:$0xff]  ;;  %p726_p1 = scmp.ge.s32.totalorder %s727_s10, %s1440_s9 }
 0x222   : >> { %736 = vst [vmem:[%s1175_s27 + $0x8] sm:$0xff] %v735_v26  ;;  %v745_v31 = vld [vmem:[%s1179_s17 + $0x30] sm:$0xff]  ;;  %v747_v32 = vld [vmem:[%s1179_s17 + $0x38] sm:$0xff]  ;;  %v749_v33 = vld [vmem:[%s1179_s17 + $0x40] sm:$0xff] }
 0x223   : >> { %738 = vst [vmem:[%s1175_s27 + $0x10] sm:$0xff] %v737_v27  ;;  %s1540_s11 = smov (%p760_p0, %s759_s11), 0  ;;  %v751_v34 = vld [vmem:[%s1179_s17 + $0x48] sm:$0xff]  ;;  %v753_v35 = vld [vmem:[%s1179_s17 + $0x50] sm:$0xff]  ;;  %v755_v36 = vld [vmem:[%s1179_s17 + $0x58] sm:$0xff] }
 0x224   : >> { %740 = vst [vmem:[%s1175_s27 + $0x18] sm:$0xff] %v739_v28  ;;  %s762_s26 = smul.u32 104, %s1540_s11  ;;  %v757_v37 = vld [vmem:[%s1179_s17 + $0x60] sm:$0xff]  ;;  %s1533_s30 = smov %s1540_s11 }
 0x225   : >> { %742 = vst [vmem:[%s1175_s27 + $0x20] sm:$0xff] %v741_v29 }
 0x226   : >> { %744 = vst [vmem:[%s1175_s27 + $0x28] sm:$0xff] %v743_v30  ;;  %s764_s12 = scalar_lea.vmem %s1399_s18, %s762_s26 [#allocation4]   ;;  %s765_s13 = scalar_lea.vmem %s1434_s22, %s762_s26  }
 0x227   : >> { %746 = vst [vmem:[%s1175_s27 + $0x30] sm:$0xff] %v745_v31  ;;  %s1532_s17 = smov %s764_s12 }
 0x228   : >> { %748 = vst [vmem:[%s1175_s27 + $0x38] sm:$0xff] %v747_v32 }
 0x229   : >> { %750 = vst [vmem:[%s1175_s27 + $0x40] sm:$0xff] %v749_v33  ;;  %729 = sbr.rel (!%p726_p1) target bundleno = 544 (0x220), region = 143 }
 0x22a   : >> { %752 = vst [vmem:[%s1175_s27 + $0x48] sm:$0xff] %v751_v34 }
 0x22b   : >> { %754 = vst [vmem:[%s1175_s27 + $0x50] sm:$0xff] %v753_v35 }
 0x22c   : >> { %756 = vst [vmem:[%s1175_s27 + $0x58] sm:$0xff] %v755_v36 }
 0x22d   : >> { %758 = vst [vmem:[%s1175_s27 + $0x60] sm:$0xff] %v757_v37  ;;  %s1531_s27 = smov %s765_s13 }
 0x22e PF: > { %1080 = sdivrem.u32 %s1538_s24, 13 }
 0x22f   : > { %s931_s14 = smul.u32 104, %s1440_s9 }
 0x231   : > { %s1505_s15 = scalar_lea.vmem %s1399_s18, %s931_s14 [#allocation4]   ;;  %s772_s16 = scalar_lea.vmem %s1434_s22, %s931_s14  }
 0x237   : > { %s1081_s19 = spop.drf %1080 }
 0x238   : > { %s1082_s20 = spop.drf %1080 }
 0x239   : > { %p933_p2 = scmp.le.s32.totalorder %s1082_s20, 0 }
 0x23a   : > { %s1189_s21 = smov (!%p933_p2), %s772_s16   ;;  %s1193_s23 = smov (!%p933_p2), %s1505_s15  }
 0x23b   : > { %866 = sbr.rel (%p933_p2) target bundleno = 584 (0x248), region = 148  ;;  %s1197_s29 = smov (!%p933_p2), 0  }
 0x23c   : > { %s1201_s10 = smov (!%p933_p2), 0  }
 0x240 LB: >> { %v782_v38 = vld [vmem:[%s1195_s23] sm:$0xff]  ;;  %s784_s18 = sadd.s32 1, %s1199_s29  ;;  %s776_s10 = sadd.s32 1, %s1203_s10   ;;  %s1203_s10 = sphi %s1201_s10, %s776_s10   ;;  %s1199_s29 = sphi %s1197_s29, %s1198_s29   ;;  %s1195_s23 = sphi %s1193_s23, %s789_s23   ;;  %s1191_s21 = sphi %s1189_s21, %s790_s21  }
 0x241   : >> { %783 = vst [vmem:[%s1191_s21] sm:$0xff] %v782_v38  ;;  %p785_p3 = scmp.ge.s32.totalorder %s784_s18, %s1082_s20  ;;  %p775_p4 = scmp.ge.s32.totalorder %s776_s10, %s1082_s20 }
 0x243   : >> { %s1542_s18 = smov (%p785_p3, %s784_s18), 0  ;;  %778 = sbr.rel (!%p775_p4) target bundleno = 576 (0x240), region = 154 }
 0x244   : >> { %s934_s24 = sshll.u32 %s1542_s18, 3  ;;  %s1198_s29 = smov %s1542_s18  }
 0x245   : >> { %s789_s23 = scalar_lea.vmem %s1505_s15, %s934_s24 [#allocation4]   ;;  %s790_s21 = scalar_lea.vmem %s772_s16, %s934_s24  }
 0x248 PF: > { %p15_p5 = scmp.ge.s32.totalorder %s1263_s28, 4   ;;  %s1534_s24 = smov %s1167_s25 }
 0x249   : > { %s1535_s25 = smov %s1271_s8  ;;  %s1536_s26 = smov %s1263_s28 }
 0x24a   :  { %17 = sbr.rel (!%p15_p5) target bundleno = 2 (0x2), region = 165 }
 0x24f   :  { %806 = vsyncpa [#allocation3], 1 }
 0x250   :  { %808 = vsyncpa [#allocation3 + $0x1], 1 }

// kernel: tpu_custom_call.1
= control target key start
LH: loop header
LB: loop body
LE: loop exit
PB: predicated region body
PF: predicated region fallthrough
CT: control target
= control target key end

     0   :  { %12 = vsyncpa [#allocation3], 0  ;;  %s1248_s24 = smov 0   ;;  %s1250_s25 = smov 0   ;;  %s1520_s0 = inlined_call_operand.vmem [shape: f32[200,4], index: 0, kind: input, shape index: {}]   ;;  %s1521_s1 = inlined_call_operand.vmem [shape: f32[4,128], index: 1, kind: input, shape index: {}]   ;;  %s1522_s2 = inlined_call_operand.vmem [shape: f32[1,128], index: 2, kind: input, shape index: {}]   ;;  %s1523_s3 = inlined_call_operand.vmem [shape: f32[128,128], index: 3, kind: input, shape index: {}]   ;;  %s1524_s4 = inlined_call_operand.vmem [shape: f32[1,128], index: 4, kind: input, shape index: {}]   ;;  %s1525_s5 = inlined_call_operand.hbm [shape: f32[128,128], index: 5, kind: input, shape index: {}]   ;;  %s1526_s6 = inlined_call_operand.vmem [shape: f32[1,128], index: 6, kind: input, shape index: {}]   ;;  %s1527_s7 = inlined_call_operand.vmem [shape: f32[200,3], index: 7, kind: output, shape index: {}]  }
   0x1   :  { %s1252_s26 = smov 0  }
   0x2 LB: > { %s1261_s27 = sadd.s32 4294967295, %s1171_s26   ;;  %s1263_s28 = sadd.s32 1, %s1171_s26   ;;  %s1171_s26 = sphi %s1252_s26, %s1536_s26   ;;  %s1167_s25 = sphi %s1250_s25, %s1535_s25   ;;  %s1163_s24 = sphi %s1248_s24, %s1534_s24  }
   0x3   : > { %s174_s29 = ssub.s32 %s1171_s26, %s1263_s28  ;;  %s177_s30 = sadd.s32 1, %s1167_s25 }
   0x4   : > { %p175_p0 = scmp.eq.s32.totalorder %s174_s29, 0  ;;  %p187_p1 = scmp.ne.s32.totalorder %s1167_s25, %s1163_s24 }
   0x5   : > { %p188_p2 = scmp.eq.s32.totalorder %s1261_s27, 1  ;;  %p906_p3 = scmp.ge.s32.totalorder %s1171_s26, 1 }
   0x6   : > { %s1271_s8 = scalar_select %p175_p0, %s1167_s25, %s177_s30  }
   0x7   : > { %p1273_p4 = por %p188_p2, %p187_p1  ;;  %p201_p5 = scmp.lt.s32.totalorder %s1171_s26, 3 }
   0x8   : > { %p980_p6 = scmp.eq.s32.totalorder %s1261_s27, 0  ;;  %s224_s12 = sshll.u32 %s1525_s5, 4  ;;  %s225_s12 = int_to_ptr.hbm [resolvable:$true] %s224_s12 }
   0x9   : > { %p202_p7 = pnand %p906_p3, %p201_p5  ;;  %s1205_s13 = smov [#allocation2]  }
   0xa   : > { %s226_s14 = sshll.u32 %s1205_s13, 4  ;;  %s1206_s15 = smov 128   ;;  %s227_s14 = int_to_ptr.vmem [resolvable:$true] %s226_s14 }
   0xb   : > { %p976_p8 = pneg %p202_p7  ;;  %s1207_s16 = smov 8  }
   0xc   : > { %262 = sbr.rel (%p202_p7) target bundleno = 584 (0x248), region = 48 }
   0xd   : > { %p977_p9 = pnand %p980_p6, %p976_p8 }
   0xf   : > { %979 = dma.hbm_to_vmem [thread:$0]  (!%p977_p9), %s225_s12, 2048, %s227_s14, [#allocation3], %s1206_s15, %s1206_s15, %s1207_s16  }
  0x11   : > { %1158 = dma.done.wait (%p980_p6), [#allocation3], 2048  }
  0x12   : > { %1160 = vsyncadd (%p980_p6), [#allocation3], 4294965248  ;;  %s1288_s17 = smul.u32 13, %s1261_s27  ;;  %vm375_vm0 = vcmask 1043456   ;;  %vm335_vm1 = vcmask 31744   ;;  %v463_v10 = vld [vmem:[%s1523_s3 + $0x78] sm:$0xff] }
  0x13   : > { %v330_v0 = vld [vmem:[%s1521_s1] sm:$0xf]  ;;  %v462_v11 = vld [vmem:[%s1523_s3 + $0x70] sm:$0xff]  ;;  %468 = vmatpush.msra.mxu1 %v463_v10  ;;  %939 = vmatpush.msra.mxu3 %v463_v10  ;;  %v461_v12 = vld [vmem:[%s1523_s3 + $0x68] sm:$0xff]  ;;  %s295_s13 = sand.u32 1, %s1163_s24   ;;  %vm613_vm2 = vcmask 23552  }
  0x14   : > { %p303_p10 = scmp.lt.s32.totalorder %s1288_s17, 24  ;;  %912 = vmatpush.msk.msra.mxu0 %vm375_vm0, %v330_v0  ;;  %v460_v13 = vld [vmem:[%s1523_s3 + $0x60] sm:$0xff]  ;;  %v459_v15 = vld [vmem:[%s1523_s3 + $0x58] sm:$0xff]  ;;  %v458_v16 = vld [vmem:[%s1523_s3 + $0x50] sm:$0xff]  ;;  %s971_s14 = smul.u32 104, %s295_s13 }
  0x15   : > { %469 = vmatpush.msra.mxu1 %v462_v11  ;;  %940 = vmatpush.msra.mxu3 %v462_v11  ;;  %v457_v17 = vld [vmem:[%s1523_s3 + $0x48] sm:$0xff]  ;;  %v456_v18 = vld [vmem:[%s1523_s3 + $0x40] sm:$0xff]  ;;  %v455_v20 = vld [vmem:[%s1523_s3 + $0x38] sm:$0xff]  ;;  %s635_s24 = ssub.s32 (%p1273_p4), 25, %s1288_s17 }
  0x16   : > { %s304_s18 = scalar_select %p303_p10, %s1288_s17, 24  ;;  %v454_v21 = vld [vmem:[%s1523_s3 + $0x30] sm:$0xff]  ;;  %v453_v22 = vld [vmem:[%s1523_s3 + $0x28] sm:$0xff]  ;;  %v452_v23 = vld [vmem:[%s1523_s3 + $0x20] sm:$0xff] }
  0x17   : > { %470 = vmatpush.msra.mxu1 %v461_v12  ;;  %941 = vmatpush.msra.mxu3 %v461_v12  ;;  %v451_v25 = vld [vmem:[%s1523_s3 + $0x18] sm:$0xff]  ;;  %v450_v26 = vld [vmem:[%s1523_s3 + $0x10] sm:$0xff]  ;;  %v449_v28 = vld [vmem:[%s1523_s3 + $0x8] sm:$0xff]  ;;  %p636_p11 = scmp.lt.s32.totalorder (%p1273_p4), %s635_s24, 13 }
  0x18   : > { %s911_s19 = sshll.u32 %s304_s18, 3  ;;  %v448_v29 = vld [vmem:[%s1523_s3] sm:$0xff]  ;;  %v552_v58 = vld [vmem:[#allocation2 + $0x78] sm:$0xff]  ;;  %v551_v59 = vld [vmem:[#allocation2 + $0x70] sm:$0xff]  ;;  %s1399_s18 = scalar_lea.vmem [#allocation4], %s971_s14  }
  0x19   : > { %s1298_s26 = scalar_lea.vmem %s1520_s0, %s911_s19  ;;  %471 = vmatpush.msra.mxu1 %v460_v13  ;;  %942 = vmatpush.msra.mxu3 %v460_v13  ;;  %v1377_v30 = vld [vmem:[%s1522_s2] ss:$0 sm:$0xff]  ;;  %v550_v60 = vld [vmem:[#allocation2 + $0x68] sm:$0xff]  ;;  %s938_s19 = smul.u32 (%p1273_p4), 104, %s1261_s27 }
  0x1a   : > { %v317_v1 = vld [vmem:[%s1298_s26] sm:$0xff]  ;;  %v318_v2 = vld [vmem:[%s1298_s26 + $0x8] sm:$0xff]  ;;  %v319_v3 = vld [vmem:[%s1298_s26 + $0x10] sm:$0xff]  ;;  %557 = vmatpush.msra.mxu2 %v552_v58 }
  0x1b   : > { %913 = vmatmul.msk.f32.vlgmr.msra.gmra.mxu0 %vm335_vm1, %v317_v1  ;;  %v320_v4 = vld [vmem:[%s1298_s26 + $0x18] sm:$0xff]  ;;  %v321_v5 = vld [vmem:[%s1298_s26 + $0x20] sm:$0xff]  ;;  %v322_v6 = vld [vmem:[%s1298_s26 + $0x28] sm:$0xff]  ;;  %472 = vmatpush.msra.mxu1 %v459_v15  ;;  %s1434_s22 = scalar_lea.vmem (%p1273_p4), %s1527_s7, %s938_s19  }
  0x1c   : > { %v323_v7 = vld [vmem:[%s1298_s26 + $0x30] sm:$0xff]  ;;  %v324_v8 = vld [vmem:[%s1298_s26 + $0x38] sm:$0xff]  ;;  %v325_v9 = vld [vmem:[%s1298_s26 + $0x40] sm:$0xff]  ;;  %943 = vmatpush.msra.mxu3 %v459_v15  ;;  %558 = vmatpush.msra.mxu2 %v551_v59 }
  0x1d   : > { %v326_v14 = vld [vmem:[%s1298_s26 + $0x48] sm:$0xff]  ;;  %473 = vmatpush.msra.mxu1 %v458_v16  ;;  %v327_v19 = vld [vmem:[%s1298_s26 + $0x50] sm:$0xff]  ;;  %v328_v24 = vld [vmem:[%s1298_s26 + $0x58] sm:$0xff] }
  0x1e   : > { %944 = vmatpush.msra.mxu3 %v458_v16  ;;  %v329_v27 = vld [vmem:[%s1298_s26 + $0x60] sm:$0xff]  ;;  %559 = vmatpush.msra.mxu2 %v550_v60  ;;  %v548_v1 = vld [vmem:[#allocation2 + $0x58] sm:$0xff]  ;;  %v542_v10 = vld [vmem:[#allocation2 + $0x28] sm:$0xff] }
  0x1f   : > { %474 = vmatpush.msra.mxu1 %v457_v17  ;;  %v549_v63 = vld [vmem:[#allocation2 + $0x60] sm:$0xff]  ;;  %v540_v15 = vld [vmem:[#allocation2 + $0x18] sm:$0xff] }
  0x20   : > { %945 = vmatpush.msra.mxu3 %v457_v17  ;;  %560 = vmatpush.msra.mxu2 %v549_v63  ;;  %v541_v13 = vld [vmem:[#allocation2 + $0x20] sm:$0xff] }
  0x21   : > { %475 = vmatpush.msra.mxu1 %v456_v18 }
  0x22   : > { %946 = vmatpush.msra.mxu3 %v456_v18  ;;  %561 = vmatpush.msra.mxu2 %v548_v1  ;;  %v539_v18 = vld [vmem:[#allocation2 + $0x10] sm:$0xff] }
  0x23   : > { %914 = vmatmul.msk.f32.gmra.mxu0 %vm335_vm1, %v318_v2  ;;  %476 = vmatpush.msra.mxu1 %v455_v20  ;;  %v547_v2 = vld [vmem:[#allocation2 + $0x50] sm:$0xff] }
  0x24   : > { %947 = vmatpush.msra.mxu3 %v455_v20  ;;  %562 = vmatpush.msra.mxu2 %v547_v2  ;;  %v538_v20 = vld [vmem:[#allocation2 + $0x8] sm:$0xff] }
  0x25   : > { %477 = vmatpush.msra.mxu1 %v454_v21 }
  0x26   : > { %948 = vmatpush.msra.mxu3 %v454_v21  ;;  %v537_v21 = vld [vmem:[#allocation2] sm:$0xff] }
  0x27   : > { %478 = vmatpush.msra.mxu1 %v453_v22 }
  0x28   : > { %949 = vmatpush.msra.mxu3 %v453_v22  ;;  %v1075_v22 = vld [vmem:[%s1524_s4] ss:$0 sm:$0xff] }
  0x29   : > { %479 = vmatpush.msra.mxu1 %v452_v23 }
  0x2a   : > { %950 = vmatpush.msra.mxu3 %v452_v23 }
  0x2b   : > { %915 = vmatmul.msk.f32.gmra.mxu0 %vm335_vm1, %v319_v3  ;;  %480 = vmatpush.msra.mxu1 %v451_v25  ;;  %v546_v3 = vld [vmem:[#allocation2 + $0x48] sm:$0xff] }
  0x2c   : > { %951 = vmatpush.msra.mxu3 %v451_v25  ;;  %563 = vmatpush.msra.mxu2 %v546_v3 }
  0x2d   : > { %481 = vmatpush.msra.mxu1 %v450_v26 }
  0x2e   : > { %952 = vmatpush.msra.mxu3 %v450_v26 }
  0x2f   : > { %482 = vmatpush.msra.mxu1 %v449_v28 }
  0x30   : > { %953 = vmatpush.msra.mxu3 %v449_v28 }
  0x31   : > { %483 = vmatpush.msra.mxu1 %v448_v29 }
  0x32   : > { %954 = vmatpush.msra.mxu3 %v448_v29 }
  0x33   : > { %916 = vmatmul.msk.f32.gmra.mxu0 %vm335_vm1, %v320_v4 }
  0x34   : > { %955 = vmatpush.msrb.mxu3 %v552_v58 }
  0x36   : > { %956 = vmatpush.msrb.mxu3 %v551_v59 }
  0x38   : > { %957 = vmatpush.msrb.mxu3 %v550_v60 }
  0x3a   : > { %958 = vmatpush.msrb.mxu3 %v549_v63 }
  0x3b   : > { %917 = vmatmul.msk.f32.gmra.mxu0 %vm335_vm1, %v321_v5 }
  0x3c   : > { %959 = vmatpush.msrb.mxu3 %v548_v1 }
  0x3e   : > { %960 = vmatpush.msrb.mxu3 %v547_v2 }
  0x40   : > { %961 = vmatpush.msrb.mxu3 %v546_v3 }
  0x43   : > { %918 = vmatmul.msk.f32.gmra.mxu0 %vm335_vm1, %v322_v6  ;;  %v545_v6 = vld [vmem:[#allocation2 + $0x40] sm:$0xff] }
  0x44   : > { %564 = vmatpush.msra.mxu2 %v545_v6  ;;  %962 = vmatpush.msrb.mxu3 %v545_v6 }
  0x4b   : > { %919 = vmatmul.msk.f32.gmra.mxu0 %vm335_vm1, %v323_v7 }
  0x53   : > { %920 = vmatmul.msk.f32.gmra.mxu0 %vm335_vm1, %v324_v8  ;;  %v544_v8 = vld [vmem:[#allocation2 + $0x38] sm:$0xff] }
  0x54   : > { %565 = vmatpush.msra.mxu2 %v544_v8  ;;  %963 = vmatpush.msrb.mxu3 %v544_v8 }
  0x5b   : > { %921 = vmatmul.msk.f32.gmra.mxu0 %vm335_vm1, %v325_v9  ;;  %v543_v9 = vld [vmem:[#allocation2 + $0x30] sm:$0xff] }
  0x5c   : > { %566 = vmatpush.msra.mxu2 %v543_v9  ;;  %964 = vmatpush.msrb.mxu3 %v543_v9 }
  0x5e   : > { %567 = vmatpush.msra.mxu2 %v542_v10  ;;  %965 = vmatpush.msrb.mxu3 %v542_v10 }
  0x60   : > { %568 = vmatpush.msra.mxu2 %v541_v13  ;;  %966 = vmatpush.msrb.mxu3 %v541_v13 }
  0x62   : > { %569 = vmatpush.msra.mxu2 %v540_v15  ;;  %967 = vmatpush.msrb.mxu3 %v540_v15 }
  0x63   : > { %922 = vmatmul.msk.f32.gmra.mxu0 %vm335_vm1, %v326_v14 }
  0x64   : > { %570 = vmatpush.msra.mxu2 %v539_v18  ;;  %968 = vmatpush.msrb.mxu3 %v539_v18 }
  0x66   : > { %571 = vmatpush.msra.mxu2 %v538_v20  ;;  %969 = vmatpush.msrb.mxu3 %v538_v20 }
  0x68   : > { %572 = vmatpush.msra.mxu2 %v537_v21  ;;  %970 = vmatpush.msrb.mxu3 %v537_v21 }
  0x6b   : > { %923 = vmatmul.msk.f32.gmra.mxu0 %vm335_vm1, %v327_v19 }
  0x73   : > { %924 = vmatmul.msk.f32.gmra.mxu0 %vm335_vm1, %v328_v24 }
  0x7b   : > { %925 = vmatmul.msk.f32.gmra.mxu0 %vm335_vm1, %v329_v27 }
  0x98   : > { %v396_v31 = vpop.f32.mrf.mxu0 }
  0x99   : > { %v397_v32 = vadd.f32 %v1377_v30, %v396_v31 }
  0x9b   : > { %v435_v33 = vmax.f32 %v397_v32, 0.0 }
  0x9d   : > { %484 = vmatmul.f32.vlgmr.msra.gmra.mxu1 %v435_v33 }
  0xa0   : > { %v399_v34 = vpop.f32.mrf.mxu0 }
  0xa1   : > { %v400_v35 = vadd.f32 %v1377_v30, %v399_v34 }
  0xa3   : > { %v436_v36 = vmax.f32 %v400_v35, 0.0 }
  0xa5   : > { %487 = vmatmul.f32.gmra.mxu1 %v436_v36 }
  0xa8   : > { %v402_v37 = vpop.f32.mrf.mxu0 }
  0xa9   : > { %v403_v38 = vadd.f32 %v1377_v30, %v402_v37 }
  0xab   : > { %v437_v39 = vmax.f32 %v403_v38, 0.0 }
  0xad   : > { %490 = vmatmul.f32.gmra.mxu1 %v437_v39 }
  0xb0   : > { %v405_v40 = vpop.f32.mrf.mxu0 }
  0xb1   : > { %v406_v41 = vadd.f32 %v1377_v30, %v405_v40 }
  0xb3   : > { %v438_v42 = vmax.f32 %v406_v41, 0.0 }
  0xb5   : > { %493 = vmatmul.f32.gmra.mxu1 %v438_v42 }
  0xb8   : > { %v408_v43 = vpop.f32.mrf.mxu0 }
  0xb9   : > { %v409_v44 = vadd.f32 %v1377_v30, %v408_v43 }
  0xbb   : > { %v439_v45 = vmax.f32 %v409_v44, 0.0 }
  0xbd   : > { %496 = vmatmul.f32.gmra.mxu1 %v439_v45 }
  0xc0   : > { %v411_v46 = vpop.f32.mrf.mxu0 }
  0xc1   : > { %v412_v47 = vadd.f32 %v1377_v30, %v411_v46 }
  0xc3   : > { %v440_v48 = vmax.f32 %v412_v47, 0.0 }
  0xc5   : > { %499 = vmatmul.f32.gmra.mxu1 %v440_v48 }
  0xc8   : > { %v414_v49 = vpop.f32.mrf.mxu0 }
  0xc9   : > { %v415_v50 = vadd.f32 %v1377_v30, %v414_v49 }
  0xcb   : > { %v441_v51 = vmax.f32 %v415_v50, 0.0 }
  0xcd   : > { %502 = vmatmul.f32.gmra.mxu1 %v441_v51 }
  0xd0   : > { %v417_v52 = vpop.f32.mrf.mxu0 }
  0xd1   : > { %v418_v53 = vadd.f32 %v1377_v30, %v417_v52 }
  0xd3   : > { %v442_v54 = vmax.f32 %v418_v53, 0.0 }
  0xd5   : > { %505 = vmatmul.f32.gmra.mxu1 %v442_v54 }
  0xd8   : > { %v420_v55 = vpop.f32.mrf.mxu0 }
  0xd9   : > { %v421_v56 = vadd.f32 %v1377_v30, %v420_v55 }
  0xdb   : > { %v443_v57 = vmax.f32 %v421_v56, 0.0 }
  0xdd   : > { %508 = vmatmul.f32.gmra.mxu1 %v443_v57 }
  0xe0   : > { %v423_v61 = vpop.f32.mrf.mxu0 }
  0xe1   : > { %v424_v62 = vadd.f32 %v1377_v30, %v423_v61 }
  0xe3   : > { %v444_v0 = vmax.f32 %v424_v62, 0.0  ;;  %v1076_v62 = vld [vmem:[%s1526_s6] ss:$0 sm:$0xff] }
  0xe5   : > { %511 = vmatmul.f32.vlgmr.msra.gmra.mxu3 %v444_v0 }
  0xe8   : > { %v426_v4 = vpop.f32.mrf.mxu0 }
  0xe9   : > { %v427_v5 = vadd.f32 %v1377_v30, %v426_v4 }
  0xeb   : > { %v445_v7 = vmax.f32 %v427_v5, 0.0 }
  0xed   : > { %514 = vmatmul.f32.gmra.mxu3 %v445_v7 }
  0xf0   : > { %v429_v11 = vpop.f32.mrf.mxu0 }
  0xf1   : > { %v430_v12 = vadd.f32 %v1377_v30, %v429_v11 }
  0xf3   : > { %v446_v14 = vmax.f32 %v430_v12, 0.0 }
  0xf5   : > { %517 = vmatmul.f32.gmra.mxu3 %v446_v14 }
  0xf8   : > { %v432_v16 = vpop.f32.mrf.mxu0 }
  0xf9   : > { %v433_v17 = vadd.f32 %v1377_v30, %v432_v16 }
  0xfb   : > { %v447_v19 = vmax.f32 %v433_v17, 0.0 }
  0xfd   : > { %520 = vmatmul.f32.gmra.mxu3 %v447_v19 }
 0x11a   : > { %v485_v23 = vpop.f32.mrf.mxu1 }
 0x11b   : > { %v486_v24 = vadd.f32 %v1075_v22, %v485_v23 }
 0x11d   : > { %v524_v25 = vmax.f32 %v486_v24, 0.0 }
 0x11f   : > { %573 = vmatmul.f32.vlgmr.msra.gmra.mxu2 %v524_v25 }
 0x122   : > { %v488_v26 = vpop.f32.mrf.mxu1 }
 0x123   : > { %v489_v27 = vadd.f32 %v1075_v22, %v488_v26 }
 0x125   : > { %v525_v28 = vmax.f32 %v489_v27, 0.0 }
 0x127   : > { %576 = vmatmul.f32.gmra.mxu2 %v525_v28 }
 0x12a   : > { %v491_v29 = vpop.f32.mrf.mxu1 }
 0x12b   : > { %v492_v30 = vadd.f32 %v1075_v22, %v491_v29 }
 0x12d   : > { %v526_v31 = vmax.f32 %v492_v30, 0.0 }
 0x12f   : > { %579 = vmatmul.f32.gmra.mxu2 %v526_v31 }
 0x132   : > { %v494_v32 = vpop.f32.mrf.mxu1 }
 0x133   : > { %v495_v33 = vadd.f32 %v1075_v22, %v494_v32 }
 0x135   : > { %v527_v34 = vmax.f32 %v495_v33, 0.0 }
 0x137   : > { %582 = vmatmul.f32.gmra.mxu2 %v527_v34 }
 0x13a   : > { %v497_v35 = vpop.f32.mrf.mxu1 }
 0x13b   : > { %v498_v36 = vadd.f32 %v1075_v22, %v497_v35 }
 0x13d   : > { %v528_v37 = vmax.f32 %v498_v36, 0.0 }
 0x13f   : > { %585 = vmatmul.f32.gmra.mxu2 %v528_v37 }
 0x142   : > { %v500_v38 = vpop.f32.mrf.mxu1 }
 0x143   : > { %v501_v39 = vadd.f32 %v1075_v22, %v500_v38 }
 0x145   : > { %v529_v40 = vmax.f32 %v501_v39, 0.0 }
 0x147   : > { %588 = vmatmul.f32.gmra.mxu2 %v529_v40 }
 0x14a   : > { %v503_v41 = vpop.f32.mrf.mxu1 }
 0x14b   : > { %v504_v42 = vadd.f32 %v1075_v22, %v503_v41 }
 0x14d   : > { %v530_v43 = vmax.f32 %v504_v42, 0.0 }
 0x14f   : > { %591 = vmatmul.f32.gmra.mxu2 %v530_v43 }
 0x152   : > { %v506_v44 = vpop.f32.mrf.mxu1 }
 0x153   : > { %v507_v45 = vadd.f32 %v1075_v22, %v506_v44 }
 0x155   : > { %v531_v46 = vmax.f32 %v507_v45, 0.0 }
 0x157   : > { %594 = vmatmul.f32.gmra.mxu2 %v531_v46 }
 0x15a   : > { %v509_v47 = vpop.f32.mrf.mxu1 }
 0x15b   : > { %v510_v48 = vadd.f32 %v1075_v22, %v509_v47 }
 0x15d   : > { %v532_v49 = vmax.f32 %v510_v48, 0.0 }
 0x15f   : > { %597 = vmatmul.f32.gmra.mxu2 %v532_v49 }
 0x168   : > { %v512_v50 = vpop.f32.mrf.mxu3 }
 0x169   : > { %v513_v51 = vadd.f32 %v1075_v22, %v512_v50 }
 0x16b   : > { %v533_v52 = vmax.f32 %v513_v51, 0.0 }
 0x16d   : > { %600 = vmatmul.f32.vlgmr.msrb.gmra.mxu3 %v533_v52 }
 0x170   : > { %v515_v53 = vpop.f32.mrf.mxu3 }
 0x171   : > { %v516_v54 = vadd.f32 %v1075_v22, %v515_v53 }
 0x173   : > { %v534_v55 = vmax.f32 %v516_v54, 0.0 }
 0x175   : > { %603 = vmatmul.f32.gmra.mxu3 %v534_v55 }
 0x178   : > { %v518_v56 = vpop.f32.mrf.mxu3 }
 0x179   : > { %v519_v57 = vadd.f32 %v1075_v22, %v518_v56 }
 0x17b   : > { %v535_v58 = vmax.f32 %v519_v57, 0.0 }
 0x17d   : > { %606 = vmatmul.f32.gmra.mxu3 %v535_v58 }
 0x180   : > { %v521_v59 = vpop.f32.mrf.mxu3 }
 0x181   : > { %v522_v60 = vadd.f32 %v1075_v22, %v521_v59 }
 0x183   : > { %v536_v61 = vmax.f32 %v522_v60, 0.0 }
 0x185   : > { %609 = vmatmul.f32.gmra.mxu3 %v536_v61 }
 0x1a2   : > { %v574_v63 = vpop.f32.mrf.mxu2 }
 0x1a3   : > { %v575_v0 = vadd.f32 %v1076_v62, %v574_v63 }
 0x1a5   : > { %614 = vst.msk [vmem:[%s1399_s18] sm:$0xff] %vm613_vm2, %v575_v0 }
 0x1aa   : > { %v577_v1 = vpop.f32.mrf.mxu2 }
 0x1ab   : > { %v578_v2 = vadd.f32 %v1076_v62, %v577_v1 }
 0x1ad   : > { %615 = vst.msk [vmem:[%s1399_s18 + $0x8] sm:$0xff] %vm613_vm2, %v578_v2 }
 0x1b2   : > { %v580_v3 = vpop.f32.mrf.mxu2 }
 0x1b3   : > { %v581_v4 = vadd.f32 %v1076_v62, %v580_v3 }
 0x1b5   : > { %616 = vst.msk [vmem:[%s1399_s18 + $0x10] sm:$0xff] %vm613_vm2, %v581_v4 }
 0x1ba   : > { %v583_v5 = vpop.f32.mrf.mxu2 }
 0x1bb   : > { %v584_v6 = vadd.f32 %v1076_v62, %v583_v5 }
 0x1bd   : > { %617 = vst.msk [vmem:[%s1399_s18 + $0x18] sm:$0xff] %vm613_vm2, %v584_v6 }
 0x1c2   : > { %v586_v7 = vpop.f32.mrf.mxu2 }
 0x1c3   : > { %v587_v8 = vadd.f32 %v1076_v62, %v586_v7 }
 0x1c5   : > { %618 = vst.msk [vmem:[%s1399_s18 + $0x20] sm:$0xff] %vm613_vm2, %v587_v8 }
 0x1ca   : > { %v589_v9 = vpop.f32.mrf.mxu2 }
 0x1cb   : > { %v590_v10 = vadd.f32 %v1076_v62, %v589_v9 }
 0x1cd   : > { %619 = vst.msk [vmem:[%s1399_s18 + $0x28] sm:$0xff] %vm613_vm2, %v590_v10 }
 0x1d2   : > { %v592_v11 = vpop.f32.mrf.mxu2 }
 0x1d3   : > { %v593_v12 = vadd.f32 %v1076_v62, %v592_v11 }
 0x1d5   : > { %620 = vst.msk [vmem:[%s1399_s18 + $0x30] sm:$0xff] %vm613_vm2, %v593_v12 }
 0x1da   : > { %v595_v13 = vpop.f32.mrf.mxu2 }
 0x1db   : > { %v596_v14 = vadd.f32 %v1076_v62, %v595_v13 }
 0x1dd   : > { %621 = vst.msk [vmem:[%s1399_s18 + $0x38] sm:$0xff] %vm613_vm2, %v596_v14 }
 0x1e2   : > { %v598_v15 = vpop.f32.mrf.mxu2 }
 0x1e3   : > { %v599_v16 = vadd.f32 %v1076_v62, %v598_v15 }
 0x1e5   : > { %622 = vst.msk [vmem:[%s1399_s18 + $0x40] sm:$0xff] %vm613_vm2, %v599_v16 }
 0x1f0   : > { %v601_v17 = vpop.f32.mrf.mxu3 }
 0x1f1   : > { %v602_v18 = vadd.f32 %v1076_v62, %v601_v17 }
 0x1f3   : > { %623 = vst.msk [vmem:[%s1399_s18 + $0x48] sm:$0xff] %vm613_vm2, %v602_v18 }
 0x1f8   : > { %v604_v19 = vpop.f32.mrf.mxu3 }
 0x1f9   : > { %v605_v20 = vadd.f32 %v1076_v62, %v604_v19 }
 0x1fb   : > { %624 = vst.msk [vmem:[%s1399_s18 + $0x50] sm:$0xff] %vm613_vm2, %v605_v20 }
 0x200   : > { %v607_v21 = vpop.f32.mrf.mxu3 }
 0x201   : > { %v608_v22 = vadd.f32 %v1076_v62, %v607_v21 }
 0x203   : > { %625 = vst.msk [vmem:[%s1399_s18 + $0x58] sm:$0xff] %vm613_vm2, %v608_v22 }
 0x207   : > { %633 = sbr.rel (!%p1273_p4) target bundleno = 584 (0x248), region = 56 }
 0x208   : > { %v610_v23 = vpop.f32.mrf.mxu3 }
 0x209   : > { %v611_v24 = vadd.f32 %v1076_v62, %v610_v23 }
 0x20b   : > { %626 = vst.msk [vmem:[%s1399_s18 + $0x60] sm:$0xff] %vm613_vm2, %v611_v24 }
 0x20c   : > { %s1538_s24 = smov (!%p636_p11, %s635_s24), 13 }
 0x20d   : > { %s926_s23 = sshll.u32 %s1538_s24, 3 }
 0x20e   : > { %p929_p12 = scmp.eq.s32.totalorder %s926_s23, 0 }
 0x20f   : > { %1077 = sdivrem.u32 (!%p929_p12), %s1538_s24, 13 }
 0x210   : > { %644 = sbr.rel (%p929_p12) target bundleno = 584 (0x248), region = 60 }
 0x218   : > { %s1440_s9 = spop.drf %1077 }
 0x219   : > { %s1079_s29 = spop.drf %1077  ;;  %p930_p13 = scmp.le.s32.totalorder %s1440_s9, 0 }
 0x21a   : > { %s1529_s27 = smov (!%p930_p13), %s1434_s22  ;;  %s1530_s17 = smov (!%p930_p13), %s1399_s18 }
 0x21b   : > { %852 = sbr.rel (%p930_p13) target bundleno = 558 (0x22e), region = 137  ;;  %s1449_s30 = smov (!%p930_p13), 0  }
 0x21c   : > { %s1451_s10 = smov (!%p930_p13), 0  }
 0x220 LB: >> { %v733_v25 = vld [vmem:[%s1179_s17] sm:$0xff]  ;;  %v735_v26 = vld [vmem:[%s1179_s17 + $0x8] sm:$0xff]  ;;  %v737_v27 = vld [vmem:[%s1179_s17 + $0x10] sm:$0xff]  ;;  %s759_s11 = sadd.s32 1, %s1183_s30  ;;  %s727_s10 = sadd.s32 1, %s1187_s10   ;;  %s1187_s10 = sphi %s1451_s10, %s727_s10   ;;  %s1183_s30 = sphi %s1449_s30, %s1533_s30   ;;  %s1179_s17 = sphi %s1530_s17, %s1532_s17   ;;  %s1175_s27 = sphi %s1529_s27, %s1531_s27  }
 0x221   : >> { %734 = vst [vmem:[%s1175_s27] sm:$0xff] %v733_v25  ;;  %v739_v28 = vld [vmem:[%s1179_s17 + $0x18] sm:$0xff]  ;;  %p760_p0 = scmp.ge.s32.totalorder %s759_s11, %s1440_s9  ;;  %v741_v29 = vld [vmem:[%s1179_s17 + $0x20] sm:$0xff]  ;;  %v743_v30 = vld [vmem:[%s1179_s17 + $0x28] sm:$0xff]  ;;  %p726_p1 = scmp.ge.s32.totalorder %s727_s10, %s1440_s9 }
 0x222   : >> { %736 = vst [vmem:[%s1175_s27 + $0x8] sm:$0xff] %v735_v26  ;;  %v745_v31 = vld [vmem:[%s1179_s17 + $0x30] sm:$0xff]  ;;  %v747_v32 = vld [vmem:[%s1179_s17 + $0x38] sm:$0xff]  ;;  %v749_v33 = vld [vmem:[%s1179_s17 + $0x40] sm:$0xff] }
 0x223   : >> { %738 = vst [vmem:[%s1175_s27 + $0x10] sm:$0xff] %v737_v27  ;;  %s1540_s11 = smov (%p760_p0, %s759_s11), 0  ;;  %v751_v34 = vld [vmem:[%s1179_s17 + $0x48] sm:$0xff]  ;;  %v753_v35 = vld [vmem:[%s1179_s17 + $0x50] sm:$0xff]  ;;  %v755_v36 = vld [vmem:[%s1179_s17 + $0x58] sm:$0xff] }
 0x224   : >> { %740 = vst [vmem:[%s1175_s27 + $0x18] sm:$0xff] %v739_v28  ;;  %s762_s26 = smul.u32 104, %s1540_s11  ;;  %v757_v37 = vld [vmem:[%s1179_s17 + $0x60] sm:$0xff]  ;;  %s1533_s30 = smov %s1540_s11 }
 0x225   : >> { %742 = vst [vmem:[%s1175_s27 + $0x20] sm:$0xff] %v741_v29 }
 0x226   : >> { %744 = vst [vmem:[%s1175_s27 + $0x28] sm:$0xff] %v743_v30  ;;  %s764_s12 = scalar_lea.vmem %s1399_s18, %s762_s26 [#allocation4]   ;;  %s765_s13 = scalar_lea.vmem %s1434_s22, %s762_s26  }
 0x227   : >> { %746 = vst [vmem:[%s1175_s27 + $0x30] sm:$0xff] %v745_v31  ;;  %s1532_s17 = smov %s764_s12 }
 0x228   : >> { %748 = vst [vmem:[%s1175_s27 + $0x38] sm:$0xff] %v747_v32 }
 0x229   : >> { %750 = vst [vmem:[%s1175_s27 + $0x40] sm:$0xff] %v749_v33  ;;  %729 = sbr.rel (!%p726_p1) target bundleno = 544 (0x220), region = 143 }
 0x22a   : >> { %752 = vst [vmem:[%s1175_s27 + $0x48] sm:$0xff] %v751_v34 }
 0x22b   : >> { %754 = vst [vmem:[%s1175_s27 + $0x50] sm:$0xff] %v753_v35 }
 0x22c   : >> { %756 = vst [vmem:[%s1175_s27 + $0x58] sm:$0xff] %v755_v36 }
 0x22d   : >> { %758 = vst [vmem:[%s1175_s27 + $0x60] sm:$0xff] %v757_v37  ;;  %s1531_s27 = smov %s765_s13 }
 0x22e PF: > { %1080 = sdivrem.u32 %s1538_s24, 13 }
 0x22f   : > { %s931_s14 = smul.u32 104, %s1440_s9 }
 0x231   : > { %s1505_s15 = scalar_lea.vmem %s1399_s18, %s931_s14 [#allocation4]   ;;  %s772_s16 = scalar_lea.vmem %s1434_s22, %s931_s14  }
 0x237   : > { %s1081_s19 = spop.drf %1080 }
 0x238   : > { %s1082_s20 = spop.drf %1080 }
 0x239   : > { %p933_p2 = scmp.le.s32.totalorder %s1082_s20, 0 }
 0x23a   : > { %s1189_s21 = smov (!%p933_p2), %s772_s16   ;;  %s1193_s23 = smov (!%p933_p2), %s1505_s15  }
 0x23b   : > { %866 = sbr.rel (%p933_p2) target bundleno = 584 (0x248), region = 148  ;;  %s1197_s29 = smov (!%p933_p2), 0  }
 0x23c   : > { %s1201_s10 = smov (!%p933_p2), 0  }
 0x240 LB: >> { %v782_v38 = vld [vmem:[%s1195_s23] sm:$0xff]  ;;  %s784_s18 = sadd.s32 1, %s1199_s29  ;;  %s776_s10 = sadd.s32 1, %s1203_s10   ;;  %s1203_s10 = sphi %s1201_s10, %s776_s10   ;;  %s1199_s29 = sphi %s1197_s29, %s1198_s29   ;;  %s1195_s23 = sphi %s1193_s23, %s789_s23   ;;  %s1191_s21 = sphi %s1189_s21, %s790_s21  }
 0x241   : >> { %783 = vst [vmem:[%s1191_s21] sm:$0xff] %v782_v38  ;;  %p785_p3 = scmp.ge.s32.totalorder %s784_s18, %s1082_s20  ;;  %p775_p4 = scmp.ge.s32.totalorder %s776_s10, %s1082_s20 }
 0x243   : >> { %s1542_s18 = smov (%p785_p3, %s784_s18), 0  ;;  %778 = sbr.rel (!%p775_p4) target bundleno = 576 (0x240), region = 154 }
 0x244   : >> { %s934_s24 = sshll.u32 %s1542_s18, 3  ;;  %s1198_s29 = smov %s1542_s18  }
 0x245   : >> { %s789_s23 = scalar_lea.vmem %s1505_s15, %s934_s24 [#allocation4]   ;;  %s790_s21 = scalar_lea.vmem %s772_s16, %s934_s24  }
 0x248 PF: > { %p15_p5 = scmp.ge.s32.totalorder %s1263_s28, 4   ;;  %s1534_s24 = smov %s1167_s25 }
 0x249   : > { %s1535_s25 = smov %s1271_s8  ;;  %s1536_s26 = smov %s1263_s28 }
 0x24a   :  { %17 = sbr.rel (!%p15_p5) target bundleno = 2 (0x2), region = 165 }
 0x24f   :  { %806 = vsyncpa [#allocation3], 1 }
 0x250   :  { %808 = vsyncpa [#allocation3 + $0x1], 1 }

</bundles_post_ra>
